<compile_context>
chip_gen: v5e
topology: v5e:2x2
jax: 0.10.0
libtpu: 0.0.40
codegen_flags: <defaults>
</compile_context>

<pallas_src>
import jax
import jax.numpy as jnp
from jax.experimental import pallas as pl
from jax.experimental.pallas import tpu as pltpu

_BN_EPS = 1e-5


# ------------------------------ weight preparation -----------------------------------
def _fold_bn(gamma, beta, mean, var, eps=_BN_EPS):
    scale = gamma / jnp.sqrt(var + eps)
    bias = beta - mean * scale
    return scale.astype(jnp.float32), bias.astype(jnp.float32)


def _conv3x3_toeplitz(w_hwio, scale, width):
    """Fold 3x3 conv (HWIO) + per-channel scale into 3 block-Toeplitz matrices.

    A[ky, c_in*Ci + i, c_out*Co + o] = w[ky, c_in - c_out + 1, i, o] * scale[o]
    (zero when |c_in - c_out| > 1).  With a (row, W*C) activation layout the conv of row
    r is  out[r] = x[r-1] @ A[0] + x[r] @ A[1] + x[r+1] @ A[2]; horizontal zero padding
    is built into the Toeplitz structure.
    """
    ci, co = w_hwio.shape[2], w_hwio.shape[3]
    w_s = (w_hwio * scale[None, None, None, :]).astype(jnp.float32)
    c_in = jnp.arange(width)[:, None]
    c_out = jnp.arange(width)[None, :]
    kx = c_in - c_out + 1                                   # (W, W)
    valid = (kx >= 0) & (kx <= 2)
    a = w_s[:, jnp.clip(kx, 0, 2)]                          # (3, W, W, Ci, Co)
    a = jnp.where(valid[None, :, :, None, None], a, 0.0)
    a = a.transpose(0, 1, 3, 2, 4).reshape(3, width * ci, width * co)
    return a


def _conv1x1_toeplitz(w_io, scale, width):
    """1x1 conv + per-channel scale as a block-diagonal (W*Ci, W*Co) matrix."""
    ci, co = w_io.shape
    w_s = (w_io * scale[None, :]).astype(jnp.float32)
    eye = jnp.eye(width, dtype=jnp.float32)
    a = eye[:, None, :, None] * w_s[None, :, None, :]       # (W, Ci, W, Co)
    return a.reshape(width * ci, width * co)


def _bias_row(bias, width):
    return jnp.tile(bias.astype(jnp.float32), width)[None, :]    # (1, W*C)


# ----------------------------------- kernel ------------------------------------------
def _resblock_body(x_ref, a1_ref, b1_ref, a2_ref, b2_ref, bsc_ref, o_ref):
    nb, h, kin = x_ref.shape            # (batch-block, H, K=W*Cin padded to 128-multiple)
    wco = o_ref.shape[-1]               # W*Cout (lane-dense)
    m = nb * h                          # matmul M dim: batch folded into rows

    # Free relayout when H is a multiple of the sublane pack (bf16: 16); H=16 here.
    x = x_ref[...].reshape(m, kin)

    # Row index of each output row within its image (masks the +/-1 vertical-tap rotates
    # at image / batch / block boundaries == zero padding in H).  NOTE: a narrower (m,1)
    # mask would cut the iota/compare work further; the full-width form is kept for
    # lowering robustness and is noise next to the matmuls.
    row_in_img = jax.lax.broadcasted_iota(jnp.int32, (nb, h, wco), 1).reshape(m, wco)
    is_top = row_in_img == 0
    is_bot = row_in_img == h - 1

    def sum_taps(y_all):
        # y_all[:, k*wco:(k+1)*wco] = x @ A[ky=k];  out[r] = t0[r-1] + t1[r] + t2[r+1],
        # realized with two cheap XLU sublane rotates + boundary selects (select, not
        # multiply, so garbage rows of a partial batch block can never contaminate).
        t0 = y_all[:, 0 * wco:1 * wco]
        t1 = y_all[:, 1 * wco:2 * wco]
        t2 = y_all[:, 2 * wco:3 * wco]
        from_above = jnp.where(is_top, 0.0, pltpu.roll(t0, shift=1, axis=0))
        from_below = jnp.where(is_bot, 0.0, pltpu.roll(t2, shift=m - 1, axis=0))
        return t1 + from_above + from_below

    # conv1 taps (+ 1x1 shortcut when present) in ONE wide MXU matmul: N = 3*wco (+wco).
    y1_all = jnp.dot(x, a1_ref[...], preferred_element_type=jnp.float32)
    y1 = jnp.maximum(sum_taps(y1_all) + b1_ref[...], 0.0)          # conv1 + BN1 + ReLU

    # conv2 taps in one wide matmul (bf16 back to the MXU, f32 accumulation).
    y2_all = jnp.dot(y1.astype(x.dtype), a2_ref[...], preferred_element_type=jnp.float32)
    y2 = sum_taps(y2_all) + b2_ref[...]                            # conv2 + BN2

    if bsc_ref is not None:             # projection shortcut: columns 3*wco.. of y1_all
        sc = y1_all[:, 3 * wco:4 * wco] + bsc_ref[...]
    else:                               # identity shortcut (wci == wco; drop K padding)
        sc = x[:, :wco].astype(jnp.float32)

    o_ref[...] = jnp.maximum(y2 + sc, 0.0).reshape(nb, h, wco).astype(o_ref.dtype)


def _kernel_projection(x_ref, a1_ref, b1_ref, a2_ref, b2_ref, bsc_ref, o_ref):
    _resblock_body(x_ref, a1_ref, b1_ref, a2_ref, b2_ref, bsc_ref, o_ref)


def _kernel_identity(x_ref, a1_ref, b1_ref, a2_ref, b2_ref, o_ref):
    _resblock_body(x_ref, a1_ref, b1_ref, a2_ref, b2_ref, None, o_ref)


# ----------------------------------- wrapper ------------------------------------------
def _tpu_budget():
    """Best-effort (VMEM capacity bytes, #TensorCores); safe fallbacks if unavailable."""
    vmem_cap, num_tc = 64 << 20, 1
    try:
        info = pltpu.get_tpu_info()
        cap = getattr(info, "vmem_capacity_bytes", None)
        if cap:
            vmem_cap = int(cap)
        for name in ("num_tensorcores", "tensorcore_count", "num_cores", "core_count"):
            v = getattr(info, name, None)
            if v:
                num_tc = int(v)
                break
    except Exception:
        pass
    return vmem_cap, num_tc


def _pick_batch_block(n, h, kin, wco, n1, vmem_cap, num_tc, in_isz, out_isz):
    n2 = 3 * wco
    per_img = (2 * h * kin * in_isz             # double-buffered input block
               + 2 * h * wco * out_isz          # double-buffered output block
               + h * (n1 + n2 + 3 * wco) * 4    # live f32 matmul results / temps
               + h * wco * 2)                   # bf16 y1 fed back to the MXU
    weight_bytes = (kin * n1 + wco * n2) * 2 + 4 * wco * 8
    budget = min(max(vmem_cap // 3, 8 << 20), 28 << 20) - weight_bytes
    nb = max(1, min(n, budget // max(per_img, 1)))
    if num_tc >= 2 and n >= 2:
        # Keep >= num_tc balanced grid steps so dimension_semantics=("parallel",) can
        # shard the batch axis across TensorCores (v7x); single-TC chips (v5e/v6e) fold
        # the whole batch into one step when it fits VMEM.
        nb = min(nb, pl.cdiv(n, num_tc))
    return int(nb)


def resblock_forward_fused(x_rows, params, *, compute_dtype=jnp.bfloat16,
                           out_dtype=jnp.float32, batch_block=None):
    """Fused ResBlock on the (N, H, W*Cin) activation layout (eval-mode BN).

    Returns (N, H, W*Cout) in `out_dtype`.  Chained ResBlocks should stay in this layout
    (and use a bf16 out_dtype) to avoid per-block NCHW<->fused HBM transposes.
    """
    n, h, wci = x_rows.shape
    cout, cin = params["w1"].shape[0], params["w1"].shape[1]
    assert wci % cin == 0, (wci, cin)
    w = wci // cin
    wco = w * cout
    has_projection = "wsc" in params

    # ---- fold eval-mode BN, build the concatenated block-Toeplitz weights -------------
    s1, b1 = _fold_bn(params["bn1_gamma"], params["bn1_beta"],
                      params["bn1_mean"], params["bn1_var"])
    s2, b2 = _fold_bn(params["bn2_gamma"], params["bn2_beta"],
                      params["bn2_mean"], params["bn2_var"])
    w1 = jnp.transpose(params["w1"], (2, 3, 1, 0)).astype(jnp.float32)   # OIHW -> HWIO
    w2 = jnp.transpose(params["w2"], (2, 3, 1, 0)).astype(jnp.float32)
    a1 = _conv3x3_toeplitz(w1, s1, w)                     # (3, wci, wco) f32
    a2 = _conv3x3_toeplitz(w2, s2, w)                     # (3, wco, wco) f32
    b1_row, b2_row = _bias_row(b1, w), _bias_row(b2, w)

    parts = [a1[0], a1[1], a1[2]]
    bsc_row = None
    if has_projection:
        ssc, bsc = _fold_bn(params["bnsc_gamma"], params["bnsc_beta"],
                            params["bnsc_mean"], params["bnsc_var"])
        wsc_io = jnp.transpose(params["wsc"][:, :, 0, 0], (1, 0)).astype(jnp.float32)
        parts.append(_conv1x1_toeplitz(wsc_io, ssc, w))   # shares LHS x with conv1 taps
        bsc_row = _bias_row(bsc, w)
    else:
        assert cin == cout, "identity shortcut requires in_channel == out_channel"

    # K (lane dim of x) zero-padded up to a 128 multiple: full-lane vloads / full MXU K.
    kin = max(128, -(-wci // 128) * 128)
    a1_cat = jnp.concatenate(parts, axis=-1)              # (wci, 3*wco [+ wco])
    if kin != wci:
        a1_cat = jnp.pad(a1_cat, ((0, kin - wci), (0, 0)))
    a1_cat = a1_cat.astype(compute_dtype)
    a2_cat = jnp.concatenate([a2[0], a2[1], a2[2]], axis=-1).astype(compute_dtype)
    n1 = a1_cat.shape[-1]

    x_rows = x_rows.astype(compute_dtype)
    if kin != wci:
        x_rows = jnp.pad(x_rows, ((0, 0), (0, 0), (0, kin - wci)))

    # ---- batch blocking + VMEM budget --------------------------------------------------
    vmem_cap, num_tc = _tpu_budget()
    if batch_block is None:
        nb = _pick_batch_block(n, h, kin, wco, n1, vmem_cap, num_tc,
                               jnp.dtype(compute_dtype).itemsize,
                               jnp.dtype(out_dtype).itemsize)
    else:
        nb = int(min(batch_block, n))
    grid_n = pl.cdiv(n, nb)
    vmem_limit = int(min(max(vmem_cap * 3 // 4, 32 << 20), 100 << 20))

    def run(single_buffer_weights):
        def w_spec(arr):
            # Grid-invariant operands: constant index_map; single-buffer when supported.
            kw = {"pipeline_mode": pl.Buffered(1)} if single_buffer_weights else {}
            idx = (lambda i: (0, 0)) if arr.ndim == 2 else (lambda i: (0, 0, 0))
            return pl.BlockSpec(arr.shape, idx, **kw)

        in_specs = [pl.BlockSpec((nb, h, kin), lambda i: (i, 0, 0)),
                    w_spec(a1_cat), w_spec(b1_row), w_spec(a2_cat), w_spec(b2_row)]
        operands = [x_rows, a1_cat, b1_row, a2_cat, b2_row]
        kernel = _kernel_identity
        if has_projection:
            in_specs.append(w_spec(bsc_row))
            operands.append(bsc_row)
            kernel = _kernel_projection

        return pl.pallas_call(
            kernel,
            out_shape=jax.ShapeDtypeStruct((n, h, wco), out_dtype),
            grid_spec=pltpu.PrefetchScalarGridSpec(
                num_scalar_prefetch=0,
                grid=(grid_n,),
                in_specs=in_specs,
                out_specs=pl.BlockSpec((nb, h, wco), lambda i: (i, 0, 0)),
            ),
            compiler_params=pltpu.CompilerParams(
                dimension_semantics=("parallel",),       # independent batch axis
                vmem_limit_bytes=vmem_limit,
            ),
        )(*operands)

    try:
        return run(single_buffer_weights=True)
    except Exception:
        # pipeline_mode=pl.Buffered(1) unsupported on this JAX -> default double-buffering.
        return run(single_buffer_weights=False)


def resblock_forward(x_nchw, params, stride=1, *, compute_dtype=jnp.bfloat16,
                     batch_block=None):
    """Fused ResBlock forward (eval-mode BN). NCHW float32 in/out, like the nn.Module."""
    # TODO(synk): stride > 1 (spatial downsampling) is not implemented in the kernel.
    assert stride == 1, "only stride=1 supported by this kernel"
    n, cin, h, w = x_nchw.shape
    cout = params["w1"].shape[0]
    # NCHW -> (N, H, W*Cin): channels fused with W on the lane axis (lane-dense stores).
    x_rows = jnp.transpose(x_nchw, (0, 2, 3, 1)).reshape(n, h, w * cin)
    out_rows = resblock_forward_fused(x_rows, params, compute_dtype=compute_dtype,
                                      out_dtype=jnp.float32, batch_block=batch_block)
    return jnp.transpose(out_rows.reshape(n, h, w, cout), (0, 3, 1, 2))


# ---------------- pure-JAX reference (eval-mode BN), for verification ----------------
def _ref_resblock(x, params, stride=1, eps=_BN_EPS):
    def conv(x, w, s):
        pad = (1, 1) if w.shape[-1] == 3 else (0, 0)
        return jax.lax.conv_general_dilated(
            x, w, (s, s), (pad, pad), dimension_numbers=("NCHW", "OIHW", "NCHW"))

    def bn(x, g, b, m, v):
        sh = (1, -1, 1, 1)
        return (x - m.reshape(sh)) / jnp.sqrt(v + eps).reshape(sh) * g.reshape(sh) + b.reshape(sh)

    out = conv(x, params["w1"], stride)
    out = jax.nn.relu(bn(out, params["bn1_gamma"], params["bn1_beta"],
                         params["bn1_mean"], params["bn1_var"]))
    out = conv(out, params["w2"], 1)
    out = bn(out, params["bn2_gamma"], params["bn2_beta"],
             params["bn2_mean"], params["bn2_var"])
    if "wsc" in params:
        sc = conv(x, params["wsc"], stride)
        sc = bn(sc, params["bnsc_gamma"], params["bnsc_beta"],
                params["bnsc_mean"], params["bnsc_var"])
    else:
        sc = x
    return jax.nn.relu(out + sc)


def _init_params(key, in_channel, out_channel):
    k1, k2, k3 = jax.random.split(key, 3)

    def conv_init(k, shape):
        fan_in = shape[1] * shape[2] * shape[3]
        bound = 1.0 / jnp.sqrt(fan_in)
        return jax.random.uniform(k, shape, jnp.float32, -bound, bound)

    p = {
        "w1": conv_init(k1, (out_channel, in_channel, 3, 3)),
        "bn1_gamma": jnp.ones((out_channel,), jnp.float32),
        "bn1_beta": jnp.zeros((out_channel,), jnp.float32),
        "bn1_mean": jnp.zeros((out_channel,), jnp.float32),
        "bn1_var": jnp.ones((out_channel,), jnp.float32),
        "w2": conv_init(k2, (out_channel, out_channel, 3, 3)),
        "bn2_gamma": jnp.ones((out_channel,), jnp.float32),
        "bn2_beta": jnp.zeros((out_channel,), jnp.float32),
        "bn2_mean": jnp.zeros((out_channel,), jnp.float32),
        "bn2_var": jnp.ones((out_channel,), jnp.float32),
    }
    if in_channel != out_channel:
        p.update({
            "wsc": conv_init(k3, (out_channel, in_channel, 1, 1)),
            "bnsc_gamma": jnp.ones((out_channel,), jnp.float32),
            "bnsc_beta": jnp.zeros((out_channel,), jnp.float32),
            "bnsc_mean": jnp.zeros((out_channel,), jnp.float32),
            "bnsc_var": jnp.ones((out_channel,), jnp.float32),
        })
    return p


if __name__ == "__main__":
    key = jax.random.PRNGKey(0)
    kx1, kp1, kx2, kp2, kx3 = jax.random.split(key, 5)

    # 1) projection-shortcut block (cin != cout): exercises the fused conv1+shortcut matmul.
    n, cin, h, w = 2, 4, 16, 16
    cout = 8
    x = jax.random.normal(kx1, (n, cin, h, w), jnp.float32)
    params = _init_params(kp1, cin, cout)
    out = jax.block_until_ready(resblock_forward(x, params, stride=1))
    ref = jax.block_until_ready(_ref_resblock(x, params, stride=1))
    assert out.shape == (n, cout, h, w), out.shape
    err = float(jnp.max(jnp.abs(out - ref)))
    assert err < 8e-2, f"projection block mismatch vs reference: {err}"

    # 2) identity-shortcut block (cin == cout): exercises the specialized kernel.
    x2 = jax.random.normal(kx2, (n, cout, h, w), jnp.float32)
    params2 = _init_params(kp2, cout, cout)
    out2 = jax.block_until_ready(resblock_forward(x2, params2, stride=1))
    ref2 = jax.block_until_ready(_ref_resblock(x2, params2, stride=1))
    err2 = float(jnp.max(jnp.abs(out2 - ref2)))
    assert err2 < 8e-2, f"identity block mismatch vs reference: {err2}"

    # 3) partial last batch block (n % batch_block != 0): boundary masking / masked writeback.
    x3 = jax.random.normal(kx3, (3, cin, h, w), jnp.float32)
    out3 = jax.block_until_ready(resblock_forward(x3, params, stride=1, batch_block=2))
    ref3 = jax.block_until_ready(_ref_resblock(x3, params, stride=1))
    err3 = float(jnp.max(jnp.abs(out3 - ref3)))
    assert err3 < 8e-2, f"partial-block mismatch vs reference: {err3}"

    print("KERNEL_OK")
</pallas_src>

<mosaic_0001>
module attributes {stable_mosaic.version = 11 : i64} {
  func.func @_kernel_projection(%arg0: i32, %arg1: memref<2x16x128xbf16, #tpu.memory_space<vmem>>, %arg2: memref<128x512xbf16, #tpu.memory_space<vmem>>, %arg3: memref<1x128xf32, #tpu.memory_space<vmem>>, %arg4: memref<128x384xbf16, #tpu.memory_space<vmem>>, %arg5: memref<1x128xf32, #tpu.memory_space<vmem>>, %arg6: memref<1x128xf32, #tpu.memory_space<vmem>>, %arg7: memref<2x16x128xf32, #tpu.memory_space<vmem>>) attributes {dimension_semantics = [#tpu.dimension_semantics<parallel>], iteration_bounds = array<i64: 1>, scalar_prefetch = 0 : i64, scratch_operands = 0 : i64, tpu.core_type = #tpu.core_type<tc>, window_params = [{transform_indices = @transform_0, window_bounds = array<i64: 2, 16, 128>}, {pipeline_mode = #tpu.pipeline_mode<synchronous>, transform_indices = @transform_1, window_bounds = array<i64: 128, 512>}, {pipeline_mode = #tpu.pipeline_mode<synchronous>, transform_indices = @transform_2, window_bounds = array<i64: 1, 128>}, {pipeline_mode = #tpu.pipeline_mode<synchronous>, transform_indices = @transform_3, window_bounds = array<i64: 128, 384>}, {pipeline_mode = #tpu.pipeline_mode<synchronous>, transform_indices = @transform_4, window_bounds = array<i64: 1, 128>}, {pipeline_mode = #tpu.pipeline_mode<synchronous>, transform_indices = @transform_5, window_bounds = array<i64: 1, 128>}, {transform_indices = @transform_6, window_bounds = array<i64: 2, 16, 128>}]} {
    %c0 = arith.constant 0 : index
    %c0_0 = arith.constant 0 : index
    %c0_1 = arith.constant 0 : index
    %0 = vector.load %arg1[%c0, %c0_0, %c0_1] : memref<2x16x128xbf16, #tpu.memory_space<vmem>>, vector<2x16x128xbf16>
    %1 = vector.shape_cast %0 : vector<2x16x128xbf16> to vector<32x128xbf16>
    %2 = tpu.iota {dimensions = array<i32: 1>} : vector<2x16x128xi32>
    %3 = vector.shape_cast %2 : vector<2x16x128xi32> to vector<32x128xi32>
    %c0_i32 = arith.constant 0 : i32
    %4 = vector.broadcast %c0_i32 : i32 to vector<32x128xi32>
    %5 = arith.cmpi eq, %3, %4 : vector<32x128xi32>
    %c15_i32 = arith.constant 15 : i32
    %6 = vector.broadcast %c15_i32 : i32 to vector<32x128xi32>
    %7 = arith.cmpi eq, %3, %6 : vector<32x128xi32>
    %c0_2 = arith.constant 0 : index
    %c0_3 = arith.constant 0 : index
    %8 = vector.load %arg2[%c0_2, %c0_3] : memref<128x512xbf16, #tpu.memory_space<vmem>>, vector<128x512xbf16>
    %cst = arith.constant dense<0.000000e+00> : vector<32x512xf32>
    %9 = tpu.matmul %1, %8, %cst {dimension_numbers = #tpu.dot_dimension_numbers<[1], [0], [0], [1], [0, 0, 1, 1], [], []>} : vector<32x128xbf16>, vector<128x512xbf16>, vector<32x512xf32> -> vector<32x512xf32>
    %10 = vector.extract_strided_slice %9 {offsets = [0, 0], sizes = [32, 128], strides = [1, 1]} : vector<32x512xf32> to vector<32x128xf32>
    %11 = vector.extract_strided_slice %9 {offsets = [0, 128], sizes = [32, 128], strides = [1, 1]} : vector<32x512xf32> to vector<32x128xf32>
    %12 = vector.extract_strided_slice %9 {offsets = [0, 256], sizes = [32, 128], strides = [1, 1]} : vector<32x512xf32> to vector<32x128xf32>
    %c1_i32 = arith.constant 1 : i32
    %13 = tpu.dynamic_rotate %10 by %c1_i32 dim 0 : vector<32x128xf32>, i32 -> vector<32x128xf32>
    %cst_4 = arith.constant 0.000000e+00 : f32
    %14 = vector.broadcast %cst_4 : f32 to vector<32x128xf32>
    %15 = arith.select %5, %14, %13 : vector<32x128xi1>, vector<32x128xf32>
    %c31_i32 = arith.constant 31 : i32
    %16 = tpu.dynamic_rotate %12 by %c31_i32 dim 0 : vector<32x128xf32>, i32 -> vector<32x128xf32>
    %cst_5 = arith.constant 0.000000e+00 : f32
    %17 = vector.broadcast %cst_5 : f32 to vector<32x128xf32>
    %18 = arith.select %7, %17, %16 : vector<32x128xi1>, vector<32x128xf32>
    %19 = arith.addf %11, %15 : vector<32x128xf32>
    %20 = arith.addf %19, %18 : vector<32x128xf32>
    %c0_6 = arith.constant 0 : index
    %c0_7 = arith.constant 0 : index
    %21 = vector.load %arg3[%c0_6, %c0_7] : memref<1x128xf32, #tpu.memory_space<vmem>>, vector<1x128xf32>
    %22 = vector.broadcast %21 : vector<1x128xf32> to vector<32x128xf32>
    %23 = arith.addf %20, %22 : vector<32x128xf32>
    %cst_8 = arith.constant 0.000000e+00 : f32
    %24 = vector.broadcast %cst_8 : f32 to vector<32x128xf32>
    %25 = arith.maximumf %23, %24 : vector<32x128xf32>
    %26 = arith.truncf %25 : vector<32x128xf32> to vector<32x128xbf16>
    %c0_9 = arith.constant 0 : index
    %c0_10 = arith.constant 0 : index
    %27 = vector.load %arg4[%c0_9, %c0_10] : memref<128x384xbf16, #tpu.memory_space<vmem>>, vector<128x384xbf16>
    %cst_11 = arith.constant dense<0.000000e+00> : vector<32x384xf32>
    %28 = tpu.matmul %26, %27, %cst_11 {dimension_numbers = #tpu.dot_dimension_numbers<[1], [0], [0], [1], [0, 0, 1, 1], [], []>} : vector<32x128xbf16>, vector<128x384xbf16>, vector<32x384xf32> -> vector<32x384xf32>
    %29 = vector.extract_strided_slice %28 {offsets = [0, 0], sizes = [32, 128], strides = [1, 1]} : vector<32x384xf32> to vector<32x128xf32>
    %30 = vector.extract_strided_slice %28 {offsets = [0, 128], sizes = [32, 128], strides = [1, 1]} : vector<32x384xf32> to vector<32x128xf32>
    %31 = vector.extract_strided_slice %28 {offsets = [0, 256], sizes = [32, 128], strides = [1, 1]} : vector<32x384xf32> to vector<32x128xf32>
    %c1_i32_12 = arith.constant 1 : i32
    %32 = tpu.dynamic_rotate %29 by %c1_i32_12 dim 0 : vector<32x128xf32>, i32 -> vector<32x128xf32>
    %cst_13 = arith.constant 0.000000e+00 : f32
    %33 = vector.broadcast %cst_13 : f32 to vector<32x128xf32>
    %34 = arith.select %5, %33, %32 : vector<32x128xi1>, vector<32x128xf32>
    %c31_i32_14 = arith.constant 31 : i32
    %35 = tpu.dynamic_rotate %31 by %c31_i32_14 dim 0 : vector<32x128xf32>, i32 -> vector<32x128xf32>
    %cst_15 = arith.constant 0.000000e+00 : f32
    %36 = vector.broadcast %cst_15 : f32 to vector<32x128xf32>
    %37 = arith.select %7, %36, %35 : vector<32x128xi1>, vector<32x128xf32>
    %38 = arith.addf %30, %34 : vector<32x128xf32>
    %39 = arith.addf %38, %37 : vector<32x128xf32>
    %c0_16 = arith.constant 0 : index
    %c0_17 = arith.constant 0 : index
    %40 = vector.load %arg5[%c0_16, %c0_17] : memref<1x128xf32, #tpu.memory_space<vmem>>, vector<1x128xf32>
    %41 = vector.broadcast %40 : vector<1x128xf32> to vector<32x128xf32>
    %42 = arith.addf %39, %41 : vector<32x128xf32>
    %43 = vector.extract_strided_slice %9 {offsets = [0, 384], sizes = [32, 128], strides = [1, 1]} : vector<32x512xf32> to vector<32x128xf32>
    %c0_18 = arith.constant 0 : index
    %c0_19 = arith.constant 0 : index
    %44 = vector.load %arg6[%c0_18, %c0_19] : memref<1x128xf32, #tpu.memory_space<vmem>>, vector<1x128xf32>
    %45 = vector.broadcast %44 : vector<1x128xf32> to vector<32x128xf32>
    %46 = arith.addf %43, %45 : vector<32x128xf32>
    %47 = arith.addf %42, %46 : vector<32x128xf32>
    %cst_20 = arith.constant 0.000000e+00 : f32
    %48 = vector.broadcast %cst_20 : f32 to vector<32x128xf32>
    %49 = arith.maximumf %47, %48 : vector<32x128xf32>
    %50 = vector.shape_cast %49 : vector<32x128xf32> to vector<2x16x128xf32>
    %c0_21 = arith.constant 0 : index
    %c0_22 = arith.constant 0 : index
    %c0_23 = arith.constant 0 : index
    %51 = vector.load %arg7[%c0_21, %c0_22, %c0_23] : memref<2x16x128xf32, #tpu.memory_space<vmem>>, vector<2x16x128xf32>
    tpu.vector_store %arg7[%c0_21, %c0_22, %c0_23], %50 {strides = array<i32>} : memref<2x16x128xf32, #tpu.memory_space<vmem>>, vector<2x16x128xf32>,
    return
  }
  func.func @transform_0(%arg0: i32) -> (i32, i32, i32) {
    %c0_i32 = arith.constant 0 : i32
    %c0_i32_0 = arith.constant 0 : i32
    %c0_i32_1 = arith.constant 0 : i32
    return %arg0, %c0_i32, %c0_i32_0 : i32, i32, i32
  }
  func.func @transform_1(%arg0: i32) -> (i32, i32) {
    %c0_i32 = arith.constant 0 : i32
    %c0_i32_0 = arith.constant 0 : i32
    %c0_i32_1 = arith.constant 0 : i32
    return %c0_i32, %c0_i32_0 : i32, i32
  }
  func.func @transform_2(%arg0: i32) -> (i32, i32) {
    %c0_i32 = arith.constant 0 : i32
    %c0_i32_0 = arith.constant 0 : i32
    %c0_i32_1 = arith.constant 0 : i32
    return %c0_i32, %c0_i32_0 : i32, i32
  }
  func.func @transform_3(%arg0: i32) -> (i32, i32) {
    %c0_i32 = arith.constant 0 : i32
    %c0_i32_0 = arith.constant 0 : i32
    %c0_i32_1 = arith.constant 0 : i32
    return %c0_i32, %c0_i32_0 : i32, i32
  }
  func.func @transform_4(%arg0: i32) -> (i32, i32) {
    %c0_i32 = arith.constant 0 : i32
    %c0_i32_0 = arith.constant 0 : i32
    %c0_i32_1 = arith.constant 0 : i32
    return %c0_i32, %c0_i32_0 : i32, i32
  }
  func.func @transform_5(%arg0: i32) -> (i32, i32) {
    %c0_i32 = arith.constant 0 : i32
    %c0_i32_0 = arith.constant 0 : i32
    %c0_i32_1 = arith.constant 0 : i32
    return %c0_i32, %c0_i32_0 : i32, i32
  }
  func.func @transform_6(%arg0: i32) -> (i32, i32, i32) {
    %c0_i32 = arith.constant 0 : i32
    %c0_i32_0 = arith.constant 0 : i32
    %c0_i32_1 = arith.constant 0 : i32
    return %arg0, %c0_i32, %c0_i32_0 : i32, i32, i32
  }
}

module attributes {stable_mosaic.version = 11 : i64} {
  func.func @_kernel_projection(%arg0: i32, %arg1: memref<2x16x128xbf16, #tpu.memory_space<vmem>>, %arg2: memref<128x512xbf16, #tpu.memory_space<vmem>>, %arg3: memref<1x128xf32, #tpu.memory_space<vmem>>, %arg4: memref<128x384xbf16, #tpu.memory_space<vmem>>, %arg5: memref<1x128xf32, #tpu.memory_space<vmem>>, %arg6: memref<1x128xf32, #tpu.memory_space<vmem>>, %arg7: memref<2x16x128xf32, #tpu.memory_space<vmem>>) attributes {dimension_semantics = [#tpu.dimension_semantics<parallel>], iteration_bounds = array<i64: 1>, scalar_prefetch = 0 : i64, scratch_operands = 0 : i64, tpu.core_type = #tpu.core_type<tc>, window_params = [{transform_indices = @transform_0, window_bounds = array<i64: 2, 16, 128>}, {pipeline_mode = #tpu.pipeline_mode<synchronous>, transform_indices = @transform_1, window_bounds = array<i64: 128, 512>}, {pipeline_mode = #tpu.pipeline_mode<synchronous>, transform_indices = @transform_2, window_bounds = array<i64: 1, 128>}, {pipeline_mode = #tpu.pipeline_mode<synchronous>, transform_indices = @transform_3, window_bounds = array<i64: 128, 384>}, {pipeline_mode = #tpu.pipeline_mode<synchronous>, transform_indices = @transform_4, window_bounds = array<i64: 1, 128>}, {pipeline_mode = #tpu.pipeline_mode<synchronous>, transform_indices = @transform_5, window_bounds = array<i64: 1, 128>}, {transform_indices = @transform_6, window_bounds = array<i64: 2, 16, 128>}]} {
    %c0 = arith.constant 0 : index
    %c0_0 = arith.constant 0 : index
    %c0_1 = arith.constant 0 : index
    %0 = vector.load %arg1[%c0, %c0_0, %c0_1] : memref<2x16x128xbf16, #tpu.memory_space<vmem>>, vector<2x16x128xbf16>
    %1 = vector.shape_cast %0 : vector<2x16x128xbf16> to vector<32x128xbf16>
    %2 = tpu.iota {dimensions = array<i32: 1>} : vector<2x16x128xi32>
    %3 = vector.shape_cast %2 : vector<2x16x128xi32> to vector<32x128xi32>
    %c0_i32 = arith.constant 0 : i32
    %4 = vector.broadcast %c0_i32 : i32 to vector<32x128xi32>
    %5 = arith.cmpi eq, %3, %4 : vector<32x128xi32>
    %c15_i32 = arith.constant 15 : i32
    %6 = vector.broadcast %c15_i32 : i32 to vector<32x128xi32>
    %7 = arith.cmpi eq, %3, %6 : vector<32x128xi32>
    %c0_2 = arith.constant 0 : index
    %c0_3 = arith.constant 0 : index
    %8 = vector.load %arg2[%c0_2, %c0_3] : memref<128x512xbf16, #tpu.memory_space<vmem>>, vector<128x512xbf16>
    %cst = arith.constant dense<0.000000e+00> : vector<32x512xf32>
    %9 = tpu.matmul %1, %8, %cst {dimension_numbers = #tpu.dot_dimension_numbers<[1], [0], [0], [1], [0, 0, 1, 1], [], []>} : vector<32x128xbf16>, vector<128x512xbf16>, vector<32x512xf32> -> vector<32x512xf32>
    %10 = vector.extract_strided_slice %9 {offsets = [0, 0], sizes = [32, 128], strides = [1, 1]} : vector<32x512xf32> to vector<32x128xf32>
    %11 = vector.extract_strided_slice %9 {offsets = [0, 128], sizes = [32, 128], strides = [1, 1]} : vector<32x512xf32> to vector<32x128xf32>
    %12 = vector.extract_strided_slice %9 {offsets = [0, 256], sizes = [32, 128], strides = [1, 1]} : vector<32x512xf32> to vector<32x128xf32>
    %c1_i32 = arith.constant 1 : i32
    %13 = tpu.dynamic_rotate %10 by %c1_i32 dim 0 : vector<32x128xf32>, i32 -> vector<32x128xf32>
    %cst_4 = arith.constant 0.000000e+00 : f32
    %14 = vector.broadcast %cst_4 : f32 to vector<32x128xf32>
    %15 = arith.select %5, %14, %13 : vector<32x128xi1>, vector<32x128xf32>
    %c31_i32 = arith.constant 31 : i32
    %16 = tpu.dynamic_rotate %12 by %c31_i32 dim 0 : vector<32x128xf32>, i32 -> vector<32x128xf32>
    %cst_5 = arith.constant 0.000000e+00 : f32
    %17 = vector.broadcast %cst_5 : f32 to vector<32x128xf32>
    %18 = arith.select %7, %17, %16 : vector<32x128xi1>, vector<32x128xf32>
    %19 = arith.addf %11, %15 : vector<32x128xf32>
    %20 = arith.addf %19, %18 : vector<32x128xf32>
    %c0_6 = arith.constant 0 : index
    %c0_7 = arith.constant 0 : index
    %21 = vector.load %arg3[%c0_6, %c0_7] : memref<1x128xf32, #tpu.memory_space<vmem>>, vector<1x128xf32>
    %22 = vector.broadcast %21 : vector<1x128xf32> to vector<32x128xf32>
    %23 = arith.addf %20, %22 : vector<32x128xf32>
    %cst_8 = arith.constant 0.000000e+00 : f32
    %24 = vector.broadcast %cst_8 : f32 to vector<32x128xf32>
    %25 = arith.maximumf %23, %24 : vector<32x128xf32>
    %26 = arith.truncf %25 : vector<32x128xf32> to vector<32x128xbf16>
    %c0_9 = arith.constant 0 : index
    %c0_10 = arith.constant 0 : index
    %27 = vector.load %arg4[%c0_9, %c0_10] : memref<128x384xbf16, #tpu.memory_space<vmem>>, vector<128x384xbf16>
    %cst_11 = arith.constant dense<0.000000e+00> : vector<32x384xf32>
    %28 = tpu.matmul %26, %27, %cst_11 {dimension_numbers = #tpu.dot_dimension_numbers<[1], [0], [0], [1], [0, 0, 1, 1], [], []>} : vector<32x128xbf16>, vector<128x384xbf16>, vector<32x384xf32> -> vector<32x384xf32>
    %29 = vector.extract_strided_slice %28 {offsets = [0, 0], sizes = [32, 128], strides = [1, 1]} : vector<32x384xf32> to vector<32x128xf32>
    %30 = vector.extract_strided_slice %28 {offsets = [0, 128], sizes = [32, 128], strides = [1, 1]} : vector<32x384xf32> to vector<32x128xf32>
    %31 = vector.extract_strided_slice %28 {offsets = [0, 256], sizes = [32, 128], strides = [1, 1]} : vector<32x384xf32> to vector<32x128xf32>
    %c1_i32_12 = arith.constant 1 : i32
    %32 = tpu.dynamic_rotate %29 by %c1_i32_12 dim 0 : vector<32x128xf32>, i32 -> vector<32x128xf32>
    %cst_13 = arith.constant 0.000000e+00 : f32
    %33 = vector.broadcast %cst_13 : f32 to vector<32x128xf32>
    %34 = arith.select %5, %33, %32 : vector<32x128xi1>, vector<32x128xf32>
    %c31_i32_14 = arith.constant 31 : i32
    %35 = tpu.dynamic_rotate %31 by %c31_i32_14 dim 0 : vector<32x128xf32>, i32 -> vector<32x128xf32>
    %cst_15 = arith.constant 0.000000e+00 : f32
    %36 = vector.broadcast %cst_15 : f32 to vector<32x128xf32>
    %37 = arith.select %7, %36, %35 : vector<32x128xi1>, vector<32x128xf32>
    %38 = arith.addf %30, %34 : vector<32x128xf32>
    %39 = arith.addf %38, %37 : vector<32x128xf32>
    %c0_16 = arith.constant 0 : index
    %c0_17 = arith.constant 0 : index
    %40 = vector.load %arg5[%c0_16, %c0_17] : memref<1x128xf32, #tpu.memory_space<vmem>>, vector<1x128xf32>
    %41 = vector.broadcast %40 : vector<1x128xf32> to vector<32x128xf32>
    %42 = arith.addf %39, %41 : vector<32x128xf32>
    %43 = vector.extract_strided_slice %9 {offsets = [0, 384], sizes = [32, 128], strides = [1, 1]} : vector<32x512xf32> to vector<32x128xf32>
    %c0_18 = arith.constant 0 : index
    %c0_19 = arith.constant 0 : index
    %44 = vector.load %arg6[%c0_18, %c0_19] : memref<1x128xf32, #tpu.memory_space<vmem>>, vector<1x128xf32>
    %45 = vector.broadcast %44 : vector<1x128xf32> to vector<32x128xf32>
    %46 = arith.addf %43, %45 : vector<32x128xf32>
    %47 = arith.addf %42, %46 : vector<32x128xf32>
    %cst_20 = arith.constant 0.000000e+00 : f32
    %48 = vector.broadcast %cst_20 : f32 to vector<32x128xf32>
    %49 = arith.maximumf %47, %48 : vector<32x128xf32>
    %50 = vector.shape_cast %49 : vector<32x128xf32> to vector<2x16x128xf32>
    %c0_21 = arith.constant 0 : index
    %c0_22 = arith.constant 0 : index
    %c0_23 = arith.constant 0 : index
    %51 = vector.load %arg7[%c0_21, %c0_22, %c0_23] : memref<2x16x128xf32, #tpu.memory_space<vmem>>, vector<2x16x128xf32>
    tpu.vector_store %arg7[%c0_21, %c0_22, %c0_23], %50 {strides = array<i32>} : memref<2x16x128xf32, #tpu.memory_space<vmem>>, vector<2x16x128xf32>,
    return
  }
  func.func @transform_0(%arg0: i32) -> (i32, i32, i32) {
    %c0_i32 = arith.constant 0 : i32
    %c0_i32_0 = arith.constant 0 : i32
    %c0_i32_1 = arith.constant 0 : i32
    return %arg0, %c0_i32, %c0_i32_0 : i32, i32, i32
  }
  func.func @transform_1(%arg0: i32) -> (i32, i32) {
    %c0_i32 = arith.constant 0 : i32
    %c0_i32_0 = arith.constant 0 : i32
    %c0_i32_1 = arith.constant 0 : i32
    return %c0_i32, %c0_i32_0 : i32, i32
  }
  func.func @transform_2(%arg0: i32) -> (i32, i32) {
    %c0_i32 = arith.constant 0 : i32
    %c0_i32_0 = arith.constant 0 : i32
    %c0_i32_1 = arith.constant 0 : i32
    return %c0_i32, %c0_i32_0 : i32, i32
  }
  func.func @transform_3(%arg0: i32) -> (i32, i32) {
    %c0_i32 = arith.constant 0 : i32
    %c0_i32_0 = arith.constant 0 : i32
    %c0_i32_1 = arith.constant 0 : i32
    return %c0_i32, %c0_i32_0 : i32, i32
  }
  func.func @transform_4(%arg0: i32) -> (i32, i32) {
    %c0_i32 = arith.constant 0 : i32
    %c0_i32_0 = arith.constant 0 : i32
    %c0_i32_1 = arith.constant 0 : i32
    return %c0_i32, %c0_i32_0 : i32, i32
  }
  func.func @transform_5(%arg0: i32) -> (i32, i32) {
    %c0_i32 = arith.constant 0 : i32
    %c0_i32_0 = arith.constant 0 : i32
    %c0_i32_1 = arith.constant 0 : i32
    return %c0_i32, %c0_i32_0 : i32, i32
  }
  func.func @transform_6(%arg0: i32) -> (i32, i32, i32) {
    %c0_i32 = arith.constant 0 : i32
    %c0_i32_0 = arith.constant 0 : i32
    %c0_i32_1 = arith.constant 0 : i32
    return %arg0, %c0_i32, %c0_i32_0 : i32, i32, i32
  }
}

</mosaic_0001>

<bundles_post_ra>
// kernel: tpu_custom_call.1
= control target key start
LH: loop header
LB: loop body
LE: loop exit
PB: predicated region body
PF: predicated region fallthrough
CT: control target
= control target key end

     0   :  { %11 = vsyncpa [#allocation3], 0  ;;  %s1253_s0 = inlined_call_operand.hbm [shape: bf16[2,16,128], index: 0, kind: input, shape index: {}]   ;;  %s1254_s1 = inlined_call_operand.hbm [shape: bf16[128,512], index: 1, kind: input, shape index: {}]   ;;  %s1255_s2 = inlined_call_operand.vmem [shape: f32[1,128], index: 2, kind: input, shape index: {}]   ;;  %s1256_s3 = inlined_call_operand.hbm [shape: bf16[128,384], index: 3, kind: input, shape index: {}]   ;;  %s1257_s4 = inlined_call_operand.vmem [shape: f32[1,128], index: 4, kind: input, shape index: {}]   ;;  %s1258_s5 = inlined_call_operand.vmem [shape: f32[1,128], index: 5, kind: input, shape index: {}]   ;;  %s1259_s6 = inlined_call_operand.hbm [shape: f32[2,16,128], index: 6, kind: output, shape index: {}]  }
   0x1   :  { %12 = vsyncpa [#allocation6], 0  ;;  %s31_s23 = sshll.u32 %s1254_s1, 4  ;;  %s32_s23 = int_to_ptr.hbm [resolvable:$true] %s31_s23 }
   0x2   :  { %13 = vsyncpa [#allocation4], 0  ;;  %s1122_s24 = smov [#allocation5]   ;;  %s18_s28 = sshll.u32 %s1253_s0, 4  ;;  %s19_s28 = int_to_ptr.hbm [resolvable:$true] %s18_s28 }
   0x3   :  { %s33_s25 = sshll.u32 %s1122_s24, 4  ;;  %s1123_s29 = smov 256   ;;  %s34_s25 = int_to_ptr.vmem [resolvable:$true] %s33_s25 }
   0x4   :  { %s1124_s30 = smov 16   ;;  %s1125_s7 = smov [#allocation2]  }
   0x5   :  { %39 = dma.hbm_to_vmem [thread:$0]  %s32_s23, 4096, %s34_s25, [#allocation6], %s1123_s29, %s1123_s29, %s1124_s30  }
   0x6   :  { %s20_s8 = sshll.u32 %s1125_s7, 4  ;;  %s1126_s9 = smov 64   ;;  %s21_s8 = int_to_ptr.vmem [resolvable:$true] %s20_s8 }
   0x7   :  { %s1127_s10 = smov 4   ;;  %s46_s12 = sshll.u32 %s1256_s3, 4  ;;  %s47_s12 = int_to_ptr.hbm [resolvable:$true] %s46_s12 }
   0x8   :  { %26 = dma.hbm_to_vmem [thread:$0]  %s19_s28, 256, %s21_s8, [#allocation3], %s1126_s9, %s1126_s9, %s1127_s10  }
   0x9   :  { %s1128_s13 = smov [#allocation7]   ;;  %s1129_s15 = smov 192  }
   0xa   :  { %s48_s14 = sshll.u32 %s1128_s13, 4  ;;  %s1130_s0 = smov 12   ;;  %s49_s14 = int_to_ptr.vmem [resolvable:$true] %s48_s14 }
   0xb   :  { %54 = dma.hbm_to_vmem [thread:$0]  %s47_s12, 3072, %s49_s14, [#allocation6], %s1129_s15, %s1129_s15, %s1130_s0  }
   0xc   :  { %1116 = dma.done.wait [#allocation3], 256  }
   0xd   :  { %1117 = vsyncadd [#allocation3], 4294967040 }
   0xe   :  { %1118 = dma.done.wait [#allocation6], 7168  }
   0xf   :  { %1119 = vsyncadd [#allocation6], 4294960128  ;;  %v829_v0 = vld [vmem:[#allocation5 + $0xe0] sm:$0xf]  ;;  %v971_v1 = vld [vmem:[#allocation5 + $0xec] sm:$0xf0] }
  0x10   :  { %v837_v2 = vld [vmem:[#allocation5 + $0xe8] sm:$0xf]  ;;  %v830_v3 = vor.u32 %v971_v1, %v829_v0  ;;  %v972_v4 = vld [vmem:[#allocation5 + $0xf4] sm:$0xf0]  ;;  %v969_v5 = vld [vmem:[#allocation5 + $0xe4] sm:$0xf] }
  0x11   :  { %v831_v6 = vld [vmem:[#allocation5 + $0xf0] sm:$0xf0]  ;;  %v838_v7 = vor.u32 %v972_v4, %v837_v2  ;;  %v813_v9 = vld [vmem:[#allocation5 + $0xc0] sm:$0xf]  ;;  %v967_v10 = vld [vmem:[#allocation5 + $0xcc] sm:$0xf0] }
  0x12   :  { %v834_v8 = vor.u32 %v969_v5, %v831_v6  ;;  %v821_v11 = vld [vmem:[#allocation5 + $0xc8] sm:$0xf]  ;;  %286 = vmatpush.bf16.msra.mxu0 %v830_v3  ;;  %v814_v12 = vor.u32 %v967_v10, %v813_v9  ;;  %v968_v13 = vld [vmem:[#allocation5 + $0xd4] sm:$0xf0]  ;;  %v965_v14 = vld [vmem:[#allocation5 + $0xc4] sm:$0xf] }
  0x13   :  { %v815_v15 = vld [vmem:[#allocation5 + $0xd0] sm:$0xf0]  ;;  %324 = vmatpush.bf16.msra.mxu2 %v838_v7  ;;  %v822_v16 = vor.u32 %v968_v13, %v821_v11  ;;  %v797_v18 = vld [vmem:[#allocation5 + $0xa0] sm:$0xf]  ;;  %v963_v19 = vld [vmem:[#allocation5 + $0xac] sm:$0xf0] }
  0x14   :  { %305 = vmatpush.bf16.msra.mxu1 %v834_v8  ;;  %v818_v17 = vor.u32 %v965_v14, %v815_v15  ;;  %v805_v20 = vld [vmem:[#allocation5 + $0xa8] sm:$0xf]  ;;  %v964_v21 = vld [vmem:[#allocation5 + $0xb4] sm:$0xf0]  ;;  %v961_v22 = vld [vmem:[#allocation5 + $0xa4] sm:$0xf]  ;;  %v798_v24 = vor.u32 %v963_v19, %v797_v18 }
  0x15   :  { %v799_v23 = vld [vmem:[#allocation5 + $0xb0] sm:$0xf0]  ;;  %v806_v25 = vor.u32 %v964_v21, %v805_v20  ;;  %v781_v27 = vld [vmem:[#allocation5 + $0x80] sm:$0xf]  ;;  %v959_v28 = vld [vmem:[#allocation5 + $0x8c] sm:$0xf0] }
  0x16   :  { %287 = vmatpush.bf16.msra.mxu0 %v814_v12  ;;  %v802_v26 = vor.u32 %v961_v22, %v799_v23  ;;  %v789_v29 = vld [vmem:[#allocation5 + $0x88] sm:$0xf]  ;;  %v960_v30 = vld [vmem:[#allocation5 + $0x94] sm:$0xf0]  ;;  %v957_v31 = vld [vmem:[#allocation5 + $0x84] sm:$0xf]  ;;  %v782_v33 = vor.u32 %v959_v28, %v781_v27 }
  0x17   :  { %325 = vmatpush.bf16.msra.mxu2 %v822_v16  ;;  %v783_v32 = vld [vmem:[#allocation5 + $0x90] sm:$0xf0]  ;;  %v790_v34 = vor.u32 %v960_v30, %v789_v29  ;;  %v765_v36 = vld [vmem:[#allocation5 + $0x60] sm:$0xf]  ;;  %v955_v37 = vld [vmem:[#allocation5 + $0x6c] sm:$0xf0] }
  0x18   :  { %306 = vmatpush.bf16.msra.mxu1 %v818_v17  ;;  %v786_v35 = vor.u32 %v957_v31, %v783_v32  ;;  %v773_v38 = vld [vmem:[#allocation5 + $0x68] sm:$0xf]  ;;  %v956_v39 = vld [vmem:[#allocation5 + $0x74] sm:$0xf0]  ;;  %v953_v40 = vld [vmem:[#allocation5 + $0x64] sm:$0xf]  ;;  %v766_v42 = vor.u32 %v955_v37, %v765_v36 }
  0x19   :  { %v767_v41 = vld [vmem:[#allocation5 + $0x70] sm:$0xf0]  ;;  %v749_v43 = vld [vmem:[#allocation5 + $0x40] sm:$0xf]  ;;  %v951_v44 = vld [vmem:[#allocation5 + $0x4c] sm:$0xf0]  ;;  %v774_v46 = vor.u32 %v956_v39, %v773_v38 }
  0x1a   :  { %288 = vmatpush.bf16.msra.mxu0 %v798_v24  ;;  %v757_v45 = vld [vmem:[#allocation5 + $0x48] sm:$0xf]  ;;  %v770_v47 = vor.u32 %v953_v40, %v767_v41  ;;  %v952_v48 = vld [vmem:[#allocation5 + $0x54] sm:$0xf0]  ;;  %v949_v49 = vld [vmem:[#allocation5 + $0x44] sm:$0xf]  ;;  %v750_v52 = vor.u32 %v951_v44, %v749_v43 }
  0x1b   :  { %326 = vmatpush.bf16.msra.mxu2 %v806_v25  ;;  %v751_v50 = vld [vmem:[#allocation5 + $0x50] sm:$0xf0]  ;;  %v733_v51 = vld [vmem:[#allocation5 + $0x20] sm:$0xf]  ;;  %v970_v53 = vld [vmem:[#allocation5 + $0xec] sm:$0xf]  ;;  %v758_v56 = vor.u32 %v952_v48, %v757_v45 }
  0x1c   :  { %307 = vmatpush.bf16.msra.mxu1 %v802_v26  ;;  %v839_v54 = vld [vmem:[#allocation5 + $0xf8] sm:$0xf0]  ;;  %v966_v55 = vld [vmem:[#allocation5 + $0xcc] sm:$0xf]  ;;  %v754_v57 = vor.u32 %v949_v49, %v751_v50  ;;  %v947_v58 = vld [vmem:[#allocation5 + $0x2c] sm:$0xf0] }
  0x1d   :  { %v741_v59 = vld [vmem:[#allocation5 + $0x28] sm:$0xf]  ;;  %v842_v60 = vor.u32 %v970_v53, %v839_v54  ;;  %v823_v61 = vld [vmem:[#allocation5 + $0xd8] sm:$0xf0]  ;;  %v948_v62 = vld [vmem:[#allocation5 + $0x34] sm:$0xf0]  ;;  %v734_v2 = vor.u32 %v947_v58, %v733_v51 }
  0x1e   :  { %289 = vmatpush.bf16.msra.mxu0 %v782_v33  ;;  %v945_v63 = vld [vmem:[#allocation5 + $0x24] sm:$0xf]  ;;  %v735_v0 = vld [vmem:[#allocation5 + $0x30] sm:$0xf0]  ;;  %v826_v1 = vor.u32 %v966_v55, %v823_v61  ;;  %v962_v3 = vld [vmem:[#allocation5 + $0xac] sm:$0xf]  ;;  %v742_v5 = vor.u32 %v948_v62, %v741_v59 }
  0x1f   :  { %327 = vmatpush.bf16.msra.mxu2 %v790_v34  ;;  %343 = vmatpush.bf16.msra.mxu3 %v842_v60  ;;  %v807_v4 = vld [vmem:[#allocation5 + $0xb8] sm:$0xf0]  ;;  %v738_v6 = vor.u32 %v945_v63, %v735_v0  ;;  %v717_v7 = vld [vmem:[#allocation5] sm:$0xf]  ;;  %v943_v8 = vld [vmem:[#allocation5 + $0xc] sm:$0xf0] }
  0x20   :  { %308 = vmatpush.bf16.msra.mxu1 %v786_v35  ;;  %v725_v9 = vld [vmem:[#allocation5 + $0x8] sm:$0xf]  ;;  %v944_v10 = vld [vmem:[#allocation5 + $0x14] sm:$0xf0]  ;;  %v941_v11 = vld [vmem:[#allocation5 + $0x4] sm:$0xf]  ;;  %v810_v13 = vor.u32 %v962_v3, %v807_v4  ;;  %v718_v14 = vor.u32 %v943_v8, %v717_v7 }
  0x21   :  { %v719_v12 = vld [vmem:[#allocation5 + $0x10] sm:$0xf0]  ;;  %v958_v15 = vld [vmem:[#allocation5 + $0x8c] sm:$0xf]  ;;  %v791_v16 = vld [vmem:[#allocation5 + $0x98] sm:$0xf0]  ;;  %v726_v17 = vor.u32 %v944_v10, %v725_v9 }
  0x22   :  { %290 = vmatpush.bf16.msra.mxu0 %v766_v42  ;;  %v722_v18 = vor.u32 %v941_v11, %v719_v12  ;;  %v939_v19 = vld [vmem:[#allocation2] sm:$0xff]  ;;  %v794_v20 = vor.u32 %v958_v15, %v791_v16  ;;  %v954_v21 = vld [vmem:[#allocation5 + $0x6c] sm:$0xf]  ;;  %v775_v22 = vld [vmem:[#allocation5 + $0x78] sm:$0xf0]  ;;  %s693_s22 = sshll.u32 %s1259_s6, 4  ;;  %s694_s22 = int_to_ptr.hbm [resolvable:$true] %s693_s22 }
  0x23   :  { %328 = vmatpush.bf16.msra.mxu2 %v774_v46  ;;  %344 = vmatpush.bf16.msra.mxu3 %v826_v1  ;;  %v778_v23 = vor.u32 %v954_v21, %v775_v22  ;;  %v1178_v24 = vld [vmem:[#allocation2 + $0x8] sm:$0xff]  ;;  %v950_v25 = vld [vmem:[#allocation5 + $0x4c] sm:$0xf]  ;;  %v937_v31 = vld [vmem:[#allocation7 + $0xb0] sm:$0xf]  ;;  %s1132_s23 = smov 128  }
  0x24   :  { %309 = vmatpush.bf16.msra.mxu1 %v770_v47  ;;  %v759_v26 = vld [vmem:[#allocation5 + $0x58] sm:$0xf0]  ;;  %v946_v28 = vld [vmem:[#allocation5 + $0x2c] sm:$0xf]  ;;  %v929_v36 = vld [vmem:[#allocation7 + $0xa8] sm:$0xf] }
  0x25   :  { %v762_v27 = vor.u32 %v950_v25, %v759_v26  ;;  %v743_v29 = vld [vmem:[#allocation5 + $0x38] sm:$0xf0]  ;;  %v942_v33 = vld [vmem:[#allocation5 + $0xc] sm:$0xf]  ;;  %v995_v37 = vld [vmem:[#allocation7 + $0xb0] sm:$0xf0] }
  0x26   :  { %291 = vmatpush.bf16.msra.mxu0 %v750_v52  ;;  %v746_v30 = vor.u32 %v946_v28, %v743_v29  ;;  %v996_v32 = vld [vmem:[#allocation7 + $0xb8] sm:$0xf0]  ;;  %v930_v39 = vor.u32 %v995_v37, %v929_v36  ;;  %v994_v40 = vld [vmem:[#allocation7 + $0xac] sm:$0xf]  ;;  %v931_v41 = vld [vmem:[#allocation7 + $0xb4] sm:$0xf0] }
  0x27   :  { %329 = vmatpush.bf16.msra.mxu2 %v758_v56  ;;  %345 = vmatpush.bf16.msra.mxu3 %v810_v13  ;;  %v938_v34 = vor.u32 %v996_v32, %v937_v31  ;;  %v727_v35 = vld [vmem:[#allocation5 + $0x18] sm:$0xf0]  ;;  %v934_v42 = vor.u32 %v994_v40, %v931_v41  ;;  %v925_v43 = vld [vmem:[#allocation7 + $0x98] sm:$0xf]  ;;  %v993_v44 = vld [vmem:[#allocation7 + $0xa0] sm:$0xf0] }
  0x28   :  { %310 = vmatpush.bf16.msra.mxu1 %v754_v57  ;;  %v730_v38 = vor.u32 %v942_v33, %v727_v35  ;;  %v917_v45 = vld [vmem:[#allocation7 + $0x90] sm:$0xf]  ;;  %v926_v46 = vor.u32 %v993_v44, %v925_v43  ;;  %v992_v47 = vld [vmem:[#allocation7 + $0x98] sm:$0xf0]  ;;  %v991_v48 = vld [vmem:[#allocation7 + $0x94] sm:$0xf] }
  0x29   :  { %v918_v49 = vor.u32 %v992_v47, %v917_v45  ;;  %v919_v50 = vld [vmem:[#allocation7 + $0x9c] sm:$0xf0]  ;;  %v990_v53 = vld [vmem:[#allocation7 + $0x88] sm:$0xf0]  ;;  %v905_v54 = vld [vmem:[#allocation7 + $0x78] sm:$0xf]  ;;  %v75_v47 = vlaneseq }
  0x2a   :  { %292 = vmatpush.bf16.msra.mxu0 %v734_v2  ;;  %v922_v51 = vor.u32 %v991_v48, %v919_v50  ;;  %v913_v52 = vld [vmem:[#allocation7 + $0x80] sm:$0xf]  ;;  %v989_v56 = vld [vmem:[#allocation7 + $0x80] sm:$0xf0]  ;;  %v988_v57 = vld [vmem:[#allocation7 + $0x7c] sm:$0xf] }
  0x2b   :  { %330 = vmatpush.bf16.msra.mxu2 %v742_v5  ;;  %346 = vmatpush.bf16.msra.mxu3 %v794_v20  ;;  %v914_v55 = vor.u32 %v990_v53, %v913_v52  ;;  %v907_v58 = vld [vmem:[#allocation7 + $0x84] sm:$0xf0]  ;;  %v906_v59 = vor.u32 %v989_v56, %v905_v54  ;;  %v987_v62 = vld [vmem:[#allocation7 + $0x70] sm:$0xf0]  ;;  %v893_v0 = vld [vmem:[#allocation7 + $0x60] sm:$0xf] }
  0x2c   :  { %311 = vmatpush.bf16.msra.mxu1 %v738_v6  ;;  %v910_v60 = vor.u32 %v988_v57, %v907_v58  ;;  %v901_v61 = vld [vmem:[#allocation7 + $0x68] sm:$0xf]  ;;  %v986_v1 = vld [vmem:[#allocation7 + $0x68] sm:$0xf0]  ;;  %v985_v2 = vld [vmem:[#allocation7 + $0x64] sm:$0xf] }
  0x2d   :  { %v902_v63 = vor.u32 %v987_v62, %v901_v61  ;;  %v894_v3 = vor.u32 %v986_v1, %v893_v0  ;;  %v895_v4 = vld [vmem:[#allocation7 + $0x6c] sm:$0xf0]  ;;  %v984_v7 = vld [vmem:[#allocation7 + $0x58] sm:$0xf0]  ;;  %v881_v8 = vld [vmem:[#allocation7 + $0x48] sm:$0xf] }
  0x2e   :  { %293 = vmatpush.bf16.msra.mxu0 %v718_v14  ;;  %v898_v5 = vor.u32 %v985_v2, %v895_v4  ;;  %v889_v6 = vld [vmem:[#allocation7 + $0x50] sm:$0xf]  ;;  %v983_v10 = vld [vmem:[#allocation7 + $0x50] sm:$0xf0]  ;;  %v982_v11 = vld [vmem:[#allocation7 + $0x4c] sm:$0xf] }
  0x2f   :  { %331 = vmatpush.bf16.msra.mxu2 %v726_v17  ;;  %347 = vmatpush.bf16.msra.mxu3 %v778_v23  ;;  %v890_v9 = vor.u32 %v984_v7, %v889_v6  ;;  %v882_v12 = vor.u32 %v983_v10, %v881_v8  ;;  %v883_v13 = vld [vmem:[#allocation7 + $0x54] sm:$0xf0]  ;;  %v981_v16 = vld [vmem:[#allocation7 + $0x40] sm:$0xf0]  ;;  %v869_v17 = vld [vmem:[#allocation7 + $0x30] sm:$0xf] }
  0x30   :  { %312 = vmatpush.bf16.msra.mxu1 %v722_v18  ;;  %v886_v14 = vor.u32 %v982_v11, %v883_v13  ;;  %v877_v15 = vld [vmem:[#allocation7 + $0x38] sm:$0xf]  ;;  %v979_v20 = vld [vmem:[#allocation7 + $0x34] sm:$0xf]  ;;  %v871_v21 = vld [vmem:[#allocation7 + $0x3c] sm:$0xf0] }
  0x31   :  { %294 = vmatmul.bf16.vlgmr.msra.gmra.mxu0 %v939_v19  ;;  %v878_v18 = vor.u32 %v981_v16, %v877_v15  ;;  %v874_v23 = vor.u32 %v979_v20, %v871_v21  ;;  %v865_v25 = vld [vmem:[#allocation7 + $0x20] sm:$0xf]  ;;  %v978_v26 = vld [vmem:[#allocation7 + $0x28] sm:$0xf0]  ;;  %v977_v29 = vld [vmem:[#allocation7 + $0x20] sm:$0xf0] }
  0x32   :  { %332 = vmatmul.bf16.vlgmr.msra.gmra.mxu2 %v939_v19  ;;  %570 = vmatpush.bf16.msrb.mxu0 %v930_v39  ;;  %v866_v28 = vor.u32 %v978_v26, %v865_v25  ;;  %v859_v31 = vld [vmem:[#allocation7 + $0x24] sm:$0xf0]  ;;  %v975_v37 = vld [vmem:[#allocation7 + $0x10] sm:$0xf0]  ;;  %v973_v40 = vld [vmem:[#allocation7 + $0x4] sm:$0xf] }
  0x33   :  { %313 = vmatmul.bf16.vlgmr.msra.gmra.mxu1 %v939_v19  ;;  %348 = vmatpush.bf16.msra.mxu3 %v762_v27  ;;  %v857_v27 = vld [vmem:[#allocation7 + $0x18] sm:$0xf]  ;;  %v853_v36 = vld [vmem:[#allocation7 + $0x8] sm:$0xf]  ;;  %v847_v41 = vld [vmem:[#allocation7 + $0xc] sm:$0xf0] }
  0x34   :  { %608 = vmatpush.bf16.msrb.mxu2 %v938_v34  ;;  %589 = vmatpush.bf16.msrb.mxu1 %v934_v42  ;;  %v858_v33 = vor.u32 %v977_v29, %v857_v27  ;;  %v850_v43 = vor.u32 %v973_v40, %v847_v41  ;;  %s1133_s24 = smov 8  }
  0x36   :  { %571 = vmatpush.bf16.msrb.mxu0 %v918_v49 }
  0x37   :  { %349 = vmatpush.bf16.msra.mxu3 %v746_v30  ;;  %v976_v30 = vld [vmem:[#allocation7 + $0x1c] sm:$0xf] }
  0x38   :  { %609 = vmatpush.bf16.msrb.mxu2 %v926_v46  ;;  %590 = vmatpush.bf16.msrb.mxu1 %v922_v51  ;;  %v862_v34 = vor.u32 %v976_v30, %v859_v31 }
  0x3a   :  { %572 = vmatpush.bf16.msrb.mxu0 %v906_v59 }
  0x3b   :  { %350 = vmatpush.bf16.msra.mxu3 %v730_v38  ;;  %v854_v38 = vor.u32 %v975_v37, %v853_v36 }
  0x3c   :  { %610 = vmatpush.bf16.msrb.mxu2 %v914_v55  ;;  %591 = vmatpush.bf16.msrb.mxu1 %v910_v60 }
  0x3e   :  { %351 = vmatmul.bf16.vlgmr.msra.gmra.mxu3 %v939_v19  ;;  %573 = vmatpush.bf16.msrb.mxu0 %v894_v3  ;;  %v980_v19 = vld [vmem:[#allocation7 + $0x38] sm:$0xf0] }
  0x3f   :  { %997 = vmatpush.bf16.msrb.mxu3 %v930_v39  ;;  %v870_v22 = vor.u32 %v980_v19, %v869_v17  ;;  %v974_v39 = vld [vmem:[#allocation7 + $0x8] sm:$0xf0] }
  0x40   :  { %611 = vmatpush.bf16.msrb.mxu2 %v902_v63  ;;  %592 = vmatpush.bf16.msrb.mxu1 %v898_v5 }
  0x41   :  { %299 = vmatmul.bf16.gmra.mxu0 %v1178_v24 }
  0x42   :  { %337 = vmatmul.bf16.gmra.mxu2 %v1178_v24  ;;  %574 = vmatpush.bf16.msrb.mxu0 %v882_v12 }
  0x43   :  { %318 = vmatmul.bf16.gmra.mxu1 %v1178_v24  ;;  %998 = vmatpush.bf16.msrb.mxu3 %v918_v49  ;;  %v1184_v49 = vshrl.u32 %v75_v47, 7 }
  0x44   :  { %612 = vmatpush.bf16.msrb.mxu2 %v890_v9  ;;  %593 = vmatpush.bf16.msrb.mxu1 %v886_v14 }
  0x45   :  { %vm366_vm0 = vcmp.lt.s32.totalorder %v1184_v49, 1  ;;  %v1188_v52 = vadd.s32 8, %v1184_v49  ;;  %vm379_vm2 = vcmp.lt.s32.totalorder %v1184_v49, 7  ;;  %vm78_vm3 = vcmp.eq.s32.totalorder %v1184_v49, 0 }
  0x46   :  { %575 = vmatpush.bf16.msrb.mxu0 %v870_v22 }
  0x47   :  { %999 = vmatpush.bf16.msrb.mxu3 %v906_v59  ;;  %vm81_vm1 = vcmp.eq.s32.totalorder %v1188_v52, 15 }
  0x48   :  { %613 = vmatpush.bf16.msrb.mxu2 %v878_v18  ;;  %594 = vmatpush.bf16.msrb.mxu1 %v874_v23 }
  0x4a   :  { %576 = vmatpush.bf16.msrb.mxu0 %v858_v33 }
  0x4b   :  { %1000 = vmatpush.bf16.msrb.mxu3 %v894_v3  ;;  %v1017_v3 = vld [vmem:[%s1255_s2] ss:$0 sm:$0xff] }
  0x4c   :  { %614 = vmatpush.bf16.msrb.mxu2 %v866_v28  ;;  %595 = vmatpush.bf16.msrb.mxu1 %v862_v34 }
  0x4e   :  { %356 = vmatmul.bf16.gmra.mxu3 %v1178_v24  ;;  %v845_v24 = vld [vmem:[#allocation7] sm:$0xf] }
  0x4f   :  { %1001 = vmatpush.bf16.msrb.mxu3 %v882_v12  ;;  %v846_v42 = vor.u32 %v974_v39, %v845_v24 }
  0x50   :  { %615 = vmatpush.bf16.msrb.mxu2 %v854_v38  ;;  %596 = vmatpush.bf16.msrb.mxu1 %v850_v43 }
  0x51   :  { %577 = vmatpush.bf16.msrb.mxu0 %v846_v42 }
  0x53   :  { %1002 = vmatpush.bf16.msrb.mxu3 %v870_v22 }
  0x57   :  { %1003 = vmatpush.bf16.msrb.mxu3 %v858_v33 }
  0x5b   :  { %1004 = vmatpush.bf16.msrb.mxu3 %v846_v42 }
  0xae   :  { %v295_v32 = vpop.f32.mrf.mxu0 }
  0xaf   :  { %v362_v53 = vrot.slane %v295_v32, 7 }
  0xb0   :  { %v314_v35 = vpop.f32.mrf.mxu1 }
  0xb5   :  { %v333_v44 = vpop.f32.mrf.mxu2 }
  0xb6   :  { %v297_v45 = vpop.f32.mrf.mxu0  ;;  %v375_v4 = vrot.slane %v333_v44, 1 }
  0xb7   :  { %v363_v51 = vrot.slane %v297_v45, 7 }
  0xb8   :  { %v316_v46 = vpop.f32.mrf.mxu1 }
  0xb9   :  { %v369_v55 = vsel %vm366_vm0, %v362_v53, %v363_v51 }
  0xba   :  { %v389_v62 = vadd.f32 %v369_v55, %v316_v46 }
  0xbd   :  { %v335_v48 = vpop.f32.mrf.mxu2 }
  0xbe   :  { %v300_v50 = vpop.f32.mrf.mxu0  ;;  %v376_v58 = vrot.slane %v335_v48, 1 }
  0xbf   :  { %v364_v56 = vrot.slane %v300_v50, 7 }
  0xc0   :  { %v319_v54 = vpop.f32.mrf.mxu1  ;;  %v382_v8 = vsel %vm379_vm2, %v375_v4, %v376_v58 }
  0xc1   :  { %v368_v0 = vsel %vm366_vm0, %v363_v51, %v364_v56  ;;  %v352_v33 = vpop.f32.mrf.mxu3 }
  0xc2   :  { %v373_v9 = vsel %vm78_vm3, 0.0, %v368_v0 }
  0xc3   :  { %v390_v16 = vadd.f32 %v373_v9, %v319_v54 }
  0xc5   :  { %v338_v57 = vpop.f32.mrf.mxu2 }
  0xc6   :  { %v377_v59 = vrot.slane %v338_v57, 1  ;;  %v302_v60 = vpop.f32.mrf.mxu0 }
  0xc7   :  { %v365_v61 = vrot.slane %v302_v60, 7 }
  0xc8   :  { %v381_v63 = vsel %vm379_vm2, %v376_v58, %v377_v59  ;;  %v321_v10 = vpop.f32.mrf.mxu1  ;;  %v1019_v58 = vld [vmem:[%s1257_s4] ss:$0 sm:$0xff]  ;;  %s1131_s4 = smov [#allocation8]  }
  0xc9   :  { %v385_v1 = vsel %vm81_vm1, 0.0, %v381_v63  ;;  %v370_v2 = vsel %vm366_vm0, %v365_v61, %v362_v53  ;;  %v367_v11 = vsel %vm366_vm0, %v364_v56, %v365_v61  ;;  %v354_v34 = vpop.f32.mrf.mxu3  ;;  %v1018_v56 = vld [vmem:[%s1258_s5] ss:$0 sm:$0xff]  ;;  %s691_s5 = sshll.u32 %s1131_s4, 4  ;;  %s692_s5 = int_to_ptr.vmem [resolvable:$true] %s691_s5 }
  0xca   :  { %v393_v5 = vadd.f32 %v389_v62, %v385_v1  ;;  %v371_v6 = vsel %vm78_vm3, 0.0, %v370_v2  ;;  %v391_v18 = vadd.f32 %v367_v11, %v321_v10  ;;  %v671_v2 = vadd.f32 %v1018_v56, %v352_v33 }
  0xcb   :  { %v388_v7 = vadd.f32 %v371_v6, %v314_v35  ;;  %v672_v6 = vadd.f32 %v1018_v56, %v354_v34 }
  0xcc   :  { %v401_v14 = vadd.f32 %v1017_v3, %v393_v5 }
  0xcd   :  { %v340_v12 = vpop.f32.mrf.mxu2  ;;  %v392_v13 = vadd.f32 %v388_v7, %v382_v8 }
  0xce   :  { %v378_v15 = vrot.slane %v340_v12, 1  ;;  %v405_v25 = vmax.f32 %v401_v14, 0.0 }
  0xcf   :  { %v400_v17 = vadd.f32 %v1017_v3, %v392_v13 }
  0xd0   :  { %v380_v19 = vsel %vm379_vm2, %v377_v59, %v378_v15  ;;  %v383_v20 = vsel %vm379_vm2, %v378_v15, %v375_v4 }
  0xd1   :  { %v387_v21 = vsel %vm81_vm1, 0.0, %v383_v20  ;;  %v394_v22 = vadd.f32 %v390_v16, %v380_v19  ;;  %v404_v23 = vmax.f32 %v400_v17, 0.0  ;;  %v357_v35 = vpop.f32.mrf.mxu3 }
  0xd2   :  { %v395_v26 = vadd.f32 %v391_v18, %v387_v21 }
  0xd3   :  { %v408_v27 = vpack.c.bf16 %v405_v25, %v404_v23  ;;  %v402_v28 = vadd.f32 %v1017_v3, %v394_v22  ;;  %v673_v25 = vadd.f32 %v1018_v56, %v357_v35 }
  0xd4   :  { %v403_v29 = vadd.f32 %v1017_v3, %v395_v26 }
  0xd5   :  { %578 = vmatmul.bf16.vlgmr.msrb.gmra.mxu0 %v408_v27  ;;  %597 = vmatmul.bf16.vlgmr.msrb.gmra.mxu1 %v408_v27  ;;  %v406_v30 = vmax.f32 %v402_v28, 0.0 }
  0xd6   :  { %616 = vmatmul.bf16.vlgmr.msrb.gmra.mxu2 %v408_v27  ;;  %v407_v31 = vmax.f32 %v403_v29, 0.0 }
  0xd8   :  { %v409_v32 = vpack.c.bf16 %v407_v31, %v406_v30 }
  0xd9   :  { %v359_v37 = vpop.f32.mrf.mxu3 }
  0xda   :  { %583 = vmatmul.bf16.vlgmr.msrb.gmra.mxu3 %v409_v32  ;;  %v674_v27 = vadd.f32 %v1018_v56, %v359_v37 }
  0xe5   :  { %602 = vmatmul.bf16.gmra.mxu1 %v409_v32 }
  0xe6   :  { %621 = vmatmul.bf16.gmra.mxu2 %v409_v32 }
 0x152   :  { %v598_v36 = vpop.f32.mrf.mxu1  ;;  %v579_v24 = vpop.f32.mrf.mxu0 }
 0x153   :  { %v627_v45 = vrot.slane %v579_v24, 7 }
 0x159   :  { %v617_v38 = vpop.f32.mrf.mxu2 }
 0x15a   :  { %v600_v39 = vpop.f32.mrf.mxu1  ;;  %v581_v42 = vpop.f32.mrf.mxu0  ;;  %v639_v51 = vrot.slane %v617_v38, 1 }
 0x15b   :  { %v628_v43 = vrot.slane %v581_v42, 7 }
 0x15d   :  { %v584_v40 = vpop.f32.mrf.mxu3  ;;  %v633_v53 = vsel %vm366_vm0, %v627_v45, %v628_v43 }
 0x15e   :  { %v629_v60 = vrot.slane %v584_v40, 7  ;;  %v652_v62 = vadd.f32 %v633_v53, %v600_v39 }
 0x160   :  { %v632_v5 = vsel %vm366_vm0, %v628_v43, %v629_v60 }
 0x161   :  { %v619_v41 = vpop.f32.mrf.mxu2  ;;  %v637_v11 = vsel %vm78_vm3, 0.0, %v632_v5 }
 0x162   :  { %v640_v47 = vrot.slane %v619_v41, 1  ;;  %v603_v48 = vpop.f32.mrf.mxu1 }
 0x163   :  { %v653_v15 = vadd.f32 %v637_v11, %v603_v48 }
 0x164   :  { %v645_v61 = vsel %vm379_vm2, %v639_v51, %v640_v47 }
 0x165   :  { %v586_v44 = vpop.f32.mrf.mxu3 }
 0x166   :  { %v630_v46 = vrot.slane %v586_v44, 7 }
 0x168   :  { %v634_v50 = vsel %vm366_vm0, %v630_v46, %v627_v45  ;;  %v631_v16 = vsel %vm366_vm0, %v629_v60, %v630_v46 }
 0x169   :  { %v635_v54 = vsel %vm78_vm3, 0.0, %v634_v50  ;;  %v622_v55 = vpop.f32.mrf.mxu2 }
 0x16a   :  { %v651_v57 = vadd.f32 %v635_v54, %v598_v36  ;;  %v641_v59 = vrot.slane %v622_v55, 1  ;;  %v605_v9 = vpop.f32.mrf.mxu1 }
 0x16b   :  { %v654_v18 = vadd.f32 %v631_v16, %v605_v9 }
 0x16c   :  { %v655_v63 = vadd.f32 %v651_v57, %v645_v61  ;;  %v644_v0 = vsel %vm379_vm2, %v640_v47, %v641_v59 }
 0x16d   :  { %v648_v1 = vsel %vm81_vm1, 0.0, %v644_v0 }
 0x16e   :  { %v663_v3 = vadd.f32 %v1019_v58, %v655_v63  ;;  %v656_v4 = vadd.f32 %v652_v62, %v648_v1 }
 0x170   :  { %v675_v7 = vadd.f32 %v671_v2, %v663_v3  ;;  %v664_v8 = vadd.f32 %v1019_v58, %v656_v4 }
 0x171   :  { %v624_v10 = vpop.f32.mrf.mxu2 }
 0x172   :  { %v679_v12 = vmax.f32 %v675_v7, 0.0  ;;  %v676_v13 = vadd.f32 %v672_v6, %v664_v8  ;;  %v642_v14 = vrot.slane %v624_v10, 1 }
 0x174   :  { %683 = vst [vmem:[#allocation8] sm:$0xff] %v679_v12  ;;  %v680_v17 = vmax.f32 %v676_v13, 0.0  ;;  %v643_v19 = vsel %vm379_vm2, %v641_v59, %v642_v14  ;;  %v646_v20 = vsel %vm379_vm2, %v642_v14, %v639_v51 }
 0x175   :  { %v650_v21 = vsel %vm81_vm1, 0.0, %v646_v20  ;;  %v657_v22 = vadd.f32 %v653_v15, %v643_v19 }
 0x176   :  { %684 = vst [vmem:[#allocation8 + $0x8] sm:$0xff] %v680_v17  ;;  %v658_v23 = vadd.f32 %v654_v18, %v650_v21 }
 0x177   :  { %v665_v26 = vadd.f32 %v1019_v58, %v657_v22 }
 0x178   :  { %v666_v28 = vadd.f32 %v1019_v58, %v658_v23 }
 0x179   :  { %v677_v29 = vadd.f32 %v673_v25, %v665_v26 }
 0x17a   :  { %v678_v30 = vadd.f32 %v674_v27, %v666_v28 }
 0x17b   :  { %v681_v49 = vmax.f32 %v677_v29, 0.0 }
 0x17c   :  { %v682_v52 = vmax.f32 %v678_v30, 0.0 }
 0x17d   :  { %685 = vst [vmem:[#allocation8 + $0x10] sm:$0xff] %v681_v49 }
 0x17e   :  { %686 = vst [vmem:[#allocation8 + $0x18] sm:$0xff] %v682_v52 }
 0x17f   :  { %699 = dma.vmem_to_hbm [thread:$0]  %s692_s5, 512, %s694_s22, [#allocation4], %s1132_s23, %s1132_s23, %s1133_s24  }
 0x180   :  { %1120 = dma.done.wait [#allocation4], 512  }
 0x181   :  { %1121 = vsyncadd [#allocation4], 4294966784 }
 0x182   :  { %704 = vsyncpa [#allocation3], 1 }
 0x183   :  { %705 = vsyncpa [#allocation6], 1 }
 0x184   :  { %706 = vsyncpa [#allocation4], 1 }

// kernel: tpu_custom_call.1
= control target key start
LH: loop header
LB: loop body
LE: loop exit
PB: predicated region body
PF: predicated region fallthrough
CT: control target
= control target key end

     0   :  { %11 = vsyncpa [#allocation3], 0  ;;  %s1253_s0 = inlined_call_operand.hbm [shape: bf16[2,16,128], index: 0, kind: input, shape index: {}]   ;;  %s1254_s1 = inlined_call_operand.hbm [shape: bf16[128,512], index: 1, kind: input, shape index: {}]   ;;  %s1255_s2 = inlined_call_operand.vmem [shape: f32[1,128], index: 2, kind: input, shape index: {}]   ;;  %s1256_s3 = inlined_call_operand.hbm [shape: bf16[128,384], index: 3, kind: input, shape index: {}]   ;;  %s1257_s4 = inlined_call_operand.vmem [shape: f32[1,128], index: 4, kind: input, shape index: {}]   ;;  %s1258_s5 = inlined_call_operand.vmem [shape: f32[1,128], index: 5, kind: input, shape index: {}]   ;;  %s1259_s6 = inlined_call_operand.hbm [shape: f32[2,16,128], index: 6, kind: output, shape index: {}]  }
   0x1   :  { %12 = vsyncpa [#allocation6], 0  ;;  %s31_s23 = sshll.u32 %s1254_s1, 4  ;;  %s32_s23 = int_to_ptr.hbm [resolvable:$true] %s31_s23 }
   0x2   :  { %13 = vsyncpa [#allocation4], 0  ;;  %s1122_s24 = smov [#allocation5]   ;;  %s18_s28 = sshll.u32 %s1253_s0, 4  ;;  %s19_s28 = int_to_ptr.hbm [resolvable:$true] %s18_s28 }
   0x3   :  { %s33_s25 = sshll.u32 %s1122_s24, 4  ;;  %s1123_s29 = smov 256   ;;  %s34_s25 = int_to_ptr.vmem [resolvable:$true] %s33_s25 }
   0x4   :  { %s1124_s30 = smov 16   ;;  %s1125_s7 = smov [#allocation2]  }
   0x5   :  { %39 = dma.hbm_to_vmem [thread:$0]  %s32_s23, 4096, %s34_s25, [#allocation6], %s1123_s29, %s1123_s29, %s1124_s30  }
   0x6   :  { %s20_s8 = sshll.u32 %s1125_s7, 4  ;;  %s1126_s9 = smov 64   ;;  %s21_s8 = int_to_ptr.vmem [resolvable:$true] %s20_s8 }
   0x7   :  { %s1127_s10 = smov 4   ;;  %s46_s12 = sshll.u32 %s1256_s3, 4  ;;  %s47_s12 = int_to_ptr.hbm [resolvable:$true] %s46_s12 }
   0x8   :  { %26 = dma.hbm_to_vmem [thread:$0]  %s19_s28, 256, %s21_s8, [#allocation3], %s1126_s9, %s1126_s9, %s1127_s10  }
   0x9   :  { %s1128_s13 = smov [#allocation7]   ;;  %s1129_s15 = smov 192  }
   0xa   :  { %s48_s14 = sshll.u32 %s1128_s13, 4  ;;  %s1130_s0 = smov 12   ;;  %s49_s14 = int_to_ptr.vmem [resolvable:$true] %s48_s14 }
   0xb   :  { %54 = dma.hbm_to_vmem [thread:$0]  %s47_s12, 3072, %s49_s14, [#allocation6], %s1129_s15, %s1129_s15, %s1130_s0  }
   0xc   :  { %1116 = dma.done.wait [#allocation3], 256  }
   0xd   :  { %1117 = vsyncadd [#allocation3], 4294967040 }
   0xe   :  { %1118 = dma.done.wait [#allocation6], 7168  }
   0xf   :  { %1119 = vsyncadd [#allocation6], 4294960128  ;;  %v829_v0 = vld [vmem:[#allocation5 + $0xe0] sm:$0xf]  ;;  %v971_v1 = vld [vmem:[#allocation5 + $0xec] sm:$0xf0] }
  0x10   :  { %v837_v2 = vld [vmem:[#allocation5 + $0xe8] sm:$0xf]  ;;  %v830_v3 = vor.u32 %v971_v1, %v829_v0  ;;  %v972_v4 = vld [vmem:[#allocation5 + $0xf4] sm:$0xf0]  ;;  %v969_v5 = vld [vmem:[#allocation5 + $0xe4] sm:$0xf] }
  0x11   :  { %v831_v6 = vld [vmem:[#allocation5 + $0xf0] sm:$0xf0]  ;;  %v838_v7 = vor.u32 %v972_v4, %v837_v2  ;;  %v813_v9 = vld [vmem:[#allocation5 + $0xc0] sm:$0xf]  ;;  %v967_v10 = vld [vmem:[#allocation5 + $0xcc] sm:$0xf0] }
  0x12   :  { %v834_v8 = vor.u32 %v969_v5, %v831_v6  ;;  %v821_v11 = vld [vmem:[#allocation5 + $0xc8] sm:$0xf]  ;;  %286 = vmatpush.bf16.msra.mxu0 %v830_v3  ;;  %v814_v12 = vor.u32 %v967_v10, %v813_v9  ;;  %v968_v13 = vld [vmem:[#allocation5 + $0xd4] sm:$0xf0]  ;;  %v965_v14 = vld [vmem:[#allocation5 + $0xc4] sm:$0xf] }
  0x13   :  { %v815_v15 = vld [vmem:[#allocation5 + $0xd0] sm:$0xf0]  ;;  %324 = vmatpush.bf16.msra.mxu2 %v838_v7  ;;  %v822_v16 = vor.u32 %v968_v13, %v821_v11  ;;  %v797_v18 = vld [vmem:[#allocation5 + $0xa0] sm:$0xf]  ;;  %v963_v19 = vld [vmem:[#allocation5 + $0xac] sm:$0xf0] }
  0x14   :  { %305 = vmatpush.bf16.msra.mxu1 %v834_v8  ;;  %v818_v17 = vor.u32 %v965_v14, %v815_v15  ;;  %v805_v20 = vld [vmem:[#allocation5 + $0xa8] sm:$0xf]  ;;  %v964_v21 = vld [vmem:[#allocation5 + $0xb4] sm:$0xf0]  ;;  %v961_v22 = vld [vmem:[#allocation5 + $0xa4] sm:$0xf]  ;;  %v798_v24 = vor.u32 %v963_v19, %v797_v18 }
  0x15   :  { %v799_v23 = vld [vmem:[#allocation5 + $0xb0] sm:$0xf0]  ;;  %v806_v25 = vor.u32 %v964_v21, %v805_v20  ;;  %v781_v27 = vld [vmem:[#allocation5 + $0x80] sm:$0xf]  ;;  %v959_v28 = vld [vmem:[#allocation5 + $0x8c] sm:$0xf0] }
  0x16   :  { %287 = vmatpush.bf16.msra.mxu0 %v814_v12  ;;  %v802_v26 = vor.u32 %v961_v22, %v799_v23  ;;  %v789_v29 = vld [vmem:[#allocation5 + $0x88] sm:$0xf]  ;;  %v960_v30 = vld [vmem:[#allocation5 + $0x94] sm:$0xf0]  ;;  %v957_v31 = vld [vmem:[#allocation5 + $0x84] sm:$0xf]  ;;  %v782_v33 = vor.u32 %v959_v28, %v781_v27 }
  0x17   :  { %325 = vmatpush.bf16.msra.mxu2 %v822_v16  ;;  %v783_v32 = vld [vmem:[#allocation5 + $0x90] sm:$0xf0]  ;;  %v790_v34 = vor.u32 %v960_v30, %v789_v29  ;;  %v765_v36 = vld [vmem:[#allocation5 + $0x60] sm:$0xf]  ;;  %v955_v37 = vld [vmem:[#allocation5 + $0x6c] sm:$0xf0] }
  0x18   :  { %306 = vmatpush.bf16.msra.mxu1 %v818_v17  ;;  %v786_v35 = vor.u32 %v957_v31, %v783_v32  ;;  %v773_v38 = vld [vmem:[#allocation5 + $0x68] sm:$0xf]  ;;  %v956_v39 = vld [vmem:[#allocation5 + $0x74] sm:$0xf0]  ;;  %v953_v40 = vld [vmem:[#allocation5 + $0x64] sm:$0xf]  ;;  %v766_v42 = vor.u32 %v955_v37, %v765_v36 }
  0x19   :  { %v767_v41 = vld [vmem:[#allocation5 + $0x70] sm:$0xf0]  ;;  %v749_v43 = vld [vmem:[#allocation5 + $0x40] sm:$0xf]  ;;  %v951_v44 = vld [vmem:[#allocation5 + $0x4c] sm:$0xf0]  ;;  %v774_v46 = vor.u32 %v956_v39, %v773_v38 }
  0x1a   :  { %288 = vmatpush.bf16.msra.mxu0 %v798_v24  ;;  %v757_v45 = vld [vmem:[#allocation5 + $0x48] sm:$0xf]  ;;  %v770_v47 = vor.u32 %v953_v40, %v767_v41  ;;  %v952_v48 = vld [vmem:[#allocation5 + $0x54] sm:$0xf0]  ;;  %v949_v49 = vld [vmem:[#allocation5 + $0x44] sm:$0xf]  ;;  %v750_v52 = vor.u32 %v951_v44, %v749_v43 }
  0x1b   :  { %326 = vmatpush.bf16.msra.mxu2 %v806_v25  ;;  %v751_v50 = vld [vmem:[#allocation5 + $0x50] sm:$0xf0]  ;;  %v733_v51 = vld [vmem:[#allocation5 + $0x20] sm:$0xf]  ;;  %v970_v53 = vld [vmem:[#allocation5 + $0xec] sm:$0xf]  ;;  %v758_v56 = vor.u32 %v952_v48, %v757_v45 }
  0x1c   :  { %307 = vmatpush.bf16.msra.mxu1 %v802_v26  ;;  %v839_v54 = vld [vmem:[#allocation5 + $0xf8] sm:$0xf0]  ;;  %v966_v55 = vld [vmem:[#allocation5 + $0xcc] sm:$0xf]  ;;  %v754_v57 = vor.u32 %v949_v49, %v751_v50  ;;  %v947_v58 = vld [vmem:[#allocation5 + $0x2c] sm:$0xf0] }
  0x1d   :  { %v741_v59 = vld [vmem:[#allocation5 + $0x28] sm:$0xf]  ;;  %v842_v60 = vor.u32 %v970_v53, %v839_v54  ;;  %v823_v61 = vld [vmem:[#allocation5 + $0xd8] sm:$0xf0]  ;;  %v948_v62 = vld [vmem:[#allocation5 + $0x34] sm:$0xf0]  ;;  %v734_v2 = vor.u32 %v947_v58, %v733_v51 }
  0x1e   :  { %289 = vmatpush.bf16.msra.mxu0 %v782_v33  ;;  %v945_v63 = vld [vmem:[#allocation5 + $0x24] sm:$0xf]  ;;  %v735_v0 = vld [vmem:[#allocation5 + $0x30] sm:$0xf0]  ;;  %v826_v1 = vor.u32 %v966_v55, %v823_v61  ;;  %v962_v3 = vld [vmem:[#allocation5 + $0xac] sm:$0xf]  ;;  %v742_v5 = vor.u32 %v948_v62, %v741_v59 }
  0x1f   :  { %327 = vmatpush.bf16.msra.mxu2 %v790_v34  ;;  %343 = vmatpush.bf16.msra.mxu3 %v842_v60  ;;  %v807_v4 = vld [vmem:[#allocation5 + $0xb8] sm:$0xf0]  ;;  %v738_v6 = vor.u32 %v945_v63, %v735_v0  ;;  %v717_v7 = vld [vmem:[#allocation5] sm:$0xf]  ;;  %v943_v8 = vld [vmem:[#allocation5 + $0xc] sm:$0xf0] }
  0x20   :  { %308 = vmatpush.bf16.msra.mxu1 %v786_v35  ;;  %v725_v9 = vld [vmem:[#allocation5 + $0x8] sm:$0xf]  ;;  %v944_v10 = vld [vmem:[#allocation5 + $0x14] sm:$0xf0]  ;;  %v941_v11 = vld [vmem:[#allocation5 + $0x4] sm:$0xf]  ;;  %v810_v13 = vor.u32 %v962_v3, %v807_v4  ;;  %v718_v14 = vor.u32 %v943_v8, %v717_v7 }
  0x21   :  { %v719_v12 = vld [vmem:[#allocation5 + $0x10] sm:$0xf0]  ;;  %v958_v15 = vld [vmem:[#allocation5 + $0x8c] sm:$0xf]  ;;  %v791_v16 = vld [vmem:[#allocation5 + $0x98] sm:$0xf0]  ;;  %v726_v17 = vor.u32 %v944_v10, %v725_v9 }
  0x22   :  { %290 = vmatpush.bf16.msra.mxu0 %v766_v42  ;;  %v722_v18 = vor.u32 %v941_v11, %v719_v12  ;;  %v939_v19 = vld [vmem:[#allocation2] sm:$0xff]  ;;  %v794_v20 = vor.u32 %v958_v15, %v791_v16  ;;  %v954_v21 = vld [vmem:[#allocation5 + $0x6c] sm:$0xf]  ;;  %v775_v22 = vld [vmem:[#allocation5 + $0x78] sm:$0xf0]  ;;  %s693_s22 = sshll.u32 %s1259_s6, 4  ;;  %s694_s22 = int_to_ptr.hbm [resolvable:$true] %s693_s22 }
  0x23   :  { %328 = vmatpush.bf16.msra.mxu2 %v774_v46  ;;  %344 = vmatpush.bf16.msra.mxu3 %v826_v1  ;;  %v778_v23 = vor.u32 %v954_v21, %v775_v22  ;;  %v1178_v24 = vld [vmem:[#allocation2 + $0x8] sm:$0xff]  ;;  %v950_v25 = vld [vmem:[#allocation5 + $0x4c] sm:$0xf]  ;;  %v937_v31 = vld [vmem:[#allocation7 + $0xb0] sm:$0xf]  ;;  %s1132_s23 = smov 128  }
  0x24   :  { %309 = vmatpush.bf16.msra.mxu1 %v770_v47  ;;  %v759_v26 = vld [vmem:[#allocation5 + $0x58] sm:$0xf0]  ;;  %v946_v28 = vld [vmem:[#allocation5 + $0x2c] sm:$0xf]  ;;  %v929_v36 = vld [vmem:[#allocation7 + $0xa8] sm:$0xf] }
  0x25   :  { %v762_v27 = vor.u32 %v950_v25, %v759_v26  ;;  %v743_v29 = vld [vmem:[#allocation5 + $0x38] sm:$0xf0]  ;;  %v942_v33 = vld [vmem:[#allocation5 + $0xc] sm:$0xf]  ;;  %v995_v37 = vld [vmem:[#allocation7 + $0xb0] sm:$0xf0] }
  0x26   :  { %291 = vmatpush.bf16.msra.mxu0 %v750_v52  ;;  %v746_v30 = vor.u32 %v946_v28, %v743_v29  ;;  %v996_v32 = vld [vmem:[#allocation7 + $0xb8] sm:$0xf0]  ;;  %v930_v39 = vor.u32 %v995_v37, %v929_v36  ;;  %v994_v40 = vld [vmem:[#allocation7 + $0xac] sm:$0xf]  ;;  %v931_v41 = vld [vmem:[#allocation7 + $0xb4] sm:$0xf0] }
  0x27   :  { %329 = vmatpush.bf16.msra.mxu2 %v758_v56  ;;  %345 = vmatpush.bf16.msra.mxu3 %v810_v13  ;;  %v938_v34 = vor.u32 %v996_v32, %v937_v31  ;;  %v727_v35 = vld [vmem:[#allocation5 + $0x18] sm:$0xf0]  ;;  %v934_v42 = vor.u32 %v994_v40, %v931_v41  ;;  %v925_v43 = vld [vmem:[#allocation7 + $0x98] sm:$0xf]  ;;  %v993_v44 = vld [vmem:[#allocation7 + $0xa0] sm:$0xf0] }
  0x28   :  { %310 = vmatpush.bf16.msra.mxu1 %v754_v57  ;;  %v730_v38 = vor.u32 %v942_v33, %v727_v35  ;;  %v917_v45 = vld [vmem:[#allocation7 + $0x90] sm:$0xf]  ;;  %v926_v46 = vor.u32 %v993_v44, %v925_v43  ;;  %v992_v47 = vld [vmem:[#allocation7 + $0x98] sm:$0xf0]  ;;  %v991_v48 = vld [vmem:[#allocation7 + $0x94] sm:$0xf] }
  0x29   :  { %v918_v49 = vor.u32 %v992_v47, %v917_v45  ;;  %v919_v50 = vld [vmem:[#allocation7 + $0x9c] sm:$0xf0]  ;;  %v990_v53 = vld [vmem:[#allocation7 + $0x88] sm:$0xf0]  ;;  %v905_v54 = vld [vmem:[#allocation7 + $0x78] sm:$0xf]  ;;  %v75_v47 = vlaneseq }
  0x2a   :  { %292 = vmatpush.bf16.msra.mxu0 %v734_v2  ;;  %v922_v51 = vor.u32 %v991_v48, %v919_v50  ;;  %v913_v52 = vld [vmem:[#allocation7 + $0x80] sm:$0xf]  ;;  %v989_v56 = vld [vmem:[#allocation7 + $0x80] sm:$0xf0]  ;;  %v988_v57 = vld [vmem:[#allocation7 + $0x7c] sm:$0xf] }
  0x2b   :  { %330 = vmatpush.bf16.msra.mxu2 %v742_v5  ;;  %346 = vmatpush.bf16.msra.mxu3 %v794_v20  ;;  %v914_v55 = vor.u32 %v990_v53, %v913_v52  ;;  %v907_v58 = vld [vmem:[#allocation7 + $0x84] sm:$0xf0]  ;;  %v906_v59 = vor.u32 %v989_v56, %v905_v54  ;;  %v987_v62 = vld [vmem:[#allocation7 + $0x70] sm:$0xf0]  ;;  %v893_v0 = vld [vmem:[#allocation7 + $0x60] sm:$0xf] }
  0x2c   :  { %311 = vmatpush.bf16.msra.mxu1 %v738_v6  ;;  %v910_v60 = vor.u32 %v988_v57, %v907_v58  ;;  %v901_v61 = vld [vmem:[#allocation7 + $0x68] sm:$0xf]  ;;  %v986_v1 = vld [vmem:[#allocation7 + $0x68] sm:$0xf0]  ;;  %v985_v2 = vld [vmem:[#allocation7 + $0x64] sm:$0xf] }
  0x2d   :  { %v902_v63 = vor.u32 %v987_v62, %v901_v61  ;;  %v894_v3 = vor.u32 %v986_v1, %v893_v0  ;;  %v895_v4 = vld [vmem:[#allocation7 + $0x6c] sm:$0xf0]  ;;  %v984_v7 = vld [vmem:[#allocation7 + $0x58] sm:$0xf0]  ;;  %v881_v8 = vld [vmem:[#allocation7 + $0x48] sm:$0xf] }
  0x2e   :  { %293 = vmatpush.bf16.msra.mxu0 %v718_v14  ;;  %v898_v5 = vor.u32 %v985_v2, %v895_v4  ;;  %v889_v6 = vld [vmem:[#allocation7 + $0x50] sm:$0xf]  ;;  %v983_v10 = vld [vmem:[#allocation7 + $0x50] sm:$0xf0]  ;;  %v982_v11 = vld [vmem:[#allocation7 + $0x4c] sm:$0xf] }
  0x2f   :  { %331 = vmatpush.bf16.msra.mxu2 %v726_v17  ;;  %347 = vmatpush.bf16.msra.mxu3 %v778_v23  ;;  %v890_v9 = vor.u32 %v984_v7, %v889_v6  ;;  %v882_v12 = vor.u32 %v983_v10, %v881_v8  ;;  %v883_v13 = vld [vmem:[#allocation7 + $0x54] sm:$0xf0]  ;;  %v981_v16 = vld [vmem:[#allocation7 + $0x40] sm:$0xf0]  ;;  %v869_v17 = vld [vmem:[#allocation7 + $0x30] sm:$0xf] }
  0x30   :  { %312 = vmatpush.bf16.msra.mxu1 %v722_v18  ;;  %v886_v14 = vor.u32 %v982_v11, %v883_v13  ;;  %v877_v15 = vld [vmem:[#allocation7 + $0x38] sm:$0xf]  ;;  %v979_v20 = vld [vmem:[#allocation7 + $0x34] sm:$0xf]  ;;  %v871_v21 = vld [vmem:[#allocation7 + $0x3c] sm:$0xf0] }
  0x31   :  { %294 = vmatmul.bf16.vlgmr.msra.gmra.mxu0 %v939_v19  ;;  %v878_v18 = vor.u32 %v981_v16, %v877_v15  ;;  %v874_v23 = vor.u32 %v979_v20, %v871_v21  ;;  %v865_v25 = vld [vmem:[#allocation7 + $0x20] sm:$0xf]  ;;  %v978_v26 = vld [vmem:[#allocation7 + $0x28] sm:$0xf0]  ;;  %v977_v29 = vld [vmem:[#allocation7 + $0x20] sm:$0xf0] }
  0x32   :  { %332 = vmatmul.bf16.vlgmr.msra.gmra.mxu2 %v939_v19  ;;  %570 = vmatpush.bf16.msrb.mxu0 %v930_v39  ;;  %v866_v28 = vor.u32 %v978_v26, %v865_v25  ;;  %v859_v31 = vld [vmem:[#allocation7 + $0x24] sm:$0xf0]  ;;  %v975_v37 = vld [vmem:[#allocation7 + $0x10] sm:$0xf0]  ;;  %v973_v40 = vld [vmem:[#allocation7 + $0x4] sm:$0xf] }
  0x33   :  { %313 = vmatmul.bf16.vlgmr.msra.gmra.mxu1 %v939_v19  ;;  %348 = vmatpush.bf16.msra.mxu3 %v762_v27  ;;  %v857_v27 = vld [vmem:[#allocation7 + $0x18] sm:$0xf]  ;;  %v853_v36 = vld [vmem:[#allocation7 + $0x8] sm:$0xf]  ;;  %v847_v41 = vld [vmem:[#allocation7 + $0xc] sm:$0xf0] }
  0x34   :  { %608 = vmatpush.bf16.msrb.mxu2 %v938_v34  ;;  %589 = vmatpush.bf16.msrb.mxu1 %v934_v42  ;;  %v858_v33 = vor.u32 %v977_v29, %v857_v27  ;;  %v850_v43 = vor.u32 %v973_v40, %v847_v41  ;;  %s1133_s24 = smov 8  }
  0x36   :  { %571 = vmatpush.bf16.msrb.mxu0 %v918_v49 }
  0x37   :  { %349 = vmatpush.bf16.msra.mxu3 %v746_v30  ;;  %v976_v30 = vld [vmem:[#allocation7 + $0x1c] sm:$0xf] }
  0x38   :  { %609 = vmatpush.bf16.msrb.mxu2 %v926_v46  ;;  %590 = vmatpush.bf16.msrb.mxu1 %v922_v51  ;;  %v862_v34 = vor.u32 %v976_v30, %v859_v31 }
  0x3a   :  { %572 = vmatpush.bf16.msrb.mxu0 %v906_v59 }
  0x3b   :  { %350 = vmatpush.bf16.msra.mxu3 %v730_v38  ;;  %v854_v38 = vor.u32 %v975_v37, %v853_v36 }
  0x3c   :  { %610 = vmatpush.bf16.msrb.mxu2 %v914_v55  ;;  %591 = vmatpush.bf16.msrb.mxu1 %v910_v60 }
  0x3e   :  { %351 = vmatmul.bf16.vlgmr.msra.gmra.mxu3 %v939_v19  ;;  %573 = vmatpush.bf16.msrb.mxu0 %v894_v3  ;;  %v980_v19 = vld [vmem:[#allocation7 + $0x38] sm:$0xf0] }
  0x3f   :  { %997 = vmatpush.bf16.msrb.mxu3 %v930_v39  ;;  %v870_v22 = vor.u32 %v980_v19, %v869_v17  ;;  %v974_v39 = vld [vmem:[#allocation7 + $0x8] sm:$0xf0] }
  0x40   :  { %611 = vmatpush.bf16.msrb.mxu2 %v902_v63  ;;  %592 = vmatpush.bf16.msrb.mxu1 %v898_v5 }
  0x41   :  { %299 = vmatmul.bf16.gmra.mxu0 %v1178_v24 }
  0x42   :  { %337 = vmatmul.bf16.gmra.mxu2 %v1178_v24  ;;  %574 = vmatpush.bf16.msrb.mxu0 %v882_v12 }
  0x43   :  { %318 = vmatmul.bf16.gmra.mxu1 %v1178_v24  ;;  %998 = vmatpush.bf16.msrb.mxu3 %v918_v49  ;;  %v1184_v49 = vshrl.u32 %v75_v47, 7 }
  0x44   :  { %612 = vmatpush.bf16.msrb.mxu2 %v890_v9  ;;  %593 = vmatpush.bf16.msrb.mxu1 %v886_v14 }
  0x45   :  { %vm366_vm0 = vcmp.lt.s32.totalorder %v1184_v49, 1  ;;  %v1188_v52 = vadd.s32 8, %v1184_v49  ;;  %vm379_vm2 = vcmp.lt.s32.totalorder %v1184_v49, 7  ;;  %vm78_vm3 = vcmp.eq.s32.totalorder %v1184_v49, 0 }
  0x46   :  { %575 = vmatpush.bf16.msrb.mxu0 %v870_v22 }
  0x47   :  { %999 = vmatpush.bf16.msrb.mxu3 %v906_v59  ;;  %vm81_vm1 = vcmp.eq.s32.totalorder %v1188_v52, 15 }
  0x48   :  { %613 = vmatpush.bf16.msrb.mxu2 %v878_v18  ;;  %594 = vmatpush.bf16.msrb.mxu1 %v874_v23 }
  0x4a   :  { %576 = vmatpush.bf16.msrb.mxu0 %v858_v33 }
  0x4b   :  { %1000 = vmatpush.bf16.msrb.mxu3 %v894_v3  ;;  %v1017_v3 = vld [vmem:[%s1255_s2] ss:$0 sm:$0xff] }
  0x4c   :  { %614 = vmatpush.bf16.msrb.mxu2 %v866_v28  ;;  %595 = vmatpush.bf16.msrb.mxu1 %v862_v34 }
  0x4e   :  { %356 = vmatmul.bf16.gmra.mxu3 %v1178_v24  ;;  %v845_v24 = vld [vmem:[#allocation7] sm:$0xf] }
  0x4f   :  { %1001 = vmatpush.bf16.msrb.mxu3 %v882_v12  ;;  %v846_v42 = vor.u32 %v974_v39, %v845_v24 }
  0x50   :  { %615 = vmatpush.bf16.msrb.mxu2 %v854_v38  ;;  %596 = vmatpush.bf16.msrb.mxu1 %v850_v43 }
  0x51   :  { %577 = vmatpush.bf16.msrb.mxu0 %v846_v42 }
  0x53   :  { %1002 = vmatpush.bf16.msrb.mxu3 %v870_v22 }
  0x57   :  { %1003 = vmatpush.bf16.msrb.mxu3 %v858_v33 }
  0x5b   :  { %1004 = vmatpush.bf16.msrb.mxu3 %v846_v42 }
  0xae   :  { %v295_v32 = vpop.f32.mrf.mxu0 }
  0xaf   :  { %v362_v53 = vrot.slane %v295_v32, 7 }
  0xb0   :  { %v314_v35 = vpop.f32.mrf.mxu1 }
  0xb5   :  { %v333_v44 = vpop.f32.mrf.mxu2 }
  0xb6   :  { %v297_v45 = vpop.f32.mrf.mxu0  ;;  %v375_v4 = vrot.slane %v333_v44, 1 }
  0xb7   :  { %v363_v51 = vrot.slane %v297_v45, 7 }
  0xb8   :  { %v316_v46 = vpop.f32.mrf.mxu1 }
  0xb9   :  { %v369_v55 = vsel %vm366_vm0, %v362_v53, %v363_v51 }
  0xba   :  { %v389_v62 = vadd.f32 %v369_v55, %v316_v46 }
  0xbd   :  { %v335_v48 = vpop.f32.mrf.mxu2 }
  0xbe   :  { %v300_v50 = vpop.f32.mrf.mxu0  ;;  %v376_v58 = vrot.slane %v335_v48, 1 }
  0xbf   :  { %v364_v56 = vrot.slane %v300_v50, 7 }
  0xc0   :  { %v319_v54 = vpop.f32.mrf.mxu1  ;;  %v382_v8 = vsel %vm379_vm2, %v375_v4, %v376_v58 }
  0xc1   :  { %v368_v0 = vsel %vm366_vm0, %v363_v51, %v364_v56  ;;  %v352_v33 = vpop.f32.mrf.mxu3 }
  0xc2   :  { %v373_v9 = vsel %vm78_vm3, 0.0, %v368_v0 }
  0xc3   :  { %v390_v16 = vadd.f32 %v373_v9, %v319_v54 }
  0xc5   :  { %v338_v57 = vpop.f32.mrf.mxu2 }
  0xc6   :  { %v377_v59 = vrot.slane %v338_v57, 1  ;;  %v302_v60 = vpop.f32.mrf.mxu0 }
  0xc7   :  { %v365_v61 = vrot.slane %v302_v60, 7 }
  0xc8   :  { %v381_v63 = vsel %vm379_vm2, %v376_v58, %v377_v59  ;;  %v321_v10 = vpop.f32.mrf.mxu1  ;;  %v1019_v58 = vld [vmem:[%s1257_s4] ss:$0 sm:$0xff]  ;;  %s1131_s4 = smov [#allocation8]  }
  0xc9   :  { %v385_v1 = vsel %vm81_vm1, 0.0, %v381_v63  ;;  %v370_v2 = vsel %vm366_vm0, %v365_v61, %v362_v53  ;;  %v367_v11 = vsel %vm366_vm0, %v364_v56, %v365_v61  ;;  %v354_v34 = vpop.f32.mrf.mxu3  ;;  %v1018_v56 = vld [vmem:[%s1258_s5] ss:$0 sm:$0xff]  ;;  %s691_s5 = sshll.u32 %s1131_s4, 4  ;;  %s692_s5 = int_to_ptr.vmem [resolvable:$true] %s691_s5 }
  0xca   :  { %v393_v5 = vadd.f32 %v389_v62, %v385_v1  ;;  %v371_v6 = vsel %vm78_vm3, 0.0, %v370_v2  ;;  %v391_v18 = vadd.f32 %v367_v11, %v321_v10  ;;  %v671_v2 = vadd.f32 %v1018_v56, %v352_v33 }
  0xcb   :  { %v388_v7 = vadd.f32 %v371_v6, %v314_v35  ;;  %v672_v6 = vadd.f32 %v1018_v56, %v354_v34 }
  0xcc   :  { %v401_v14 = vadd.f32 %v1017_v3, %v393_v5 }
  0xcd   :  { %v340_v12 = vpop.f32.mrf.mxu2  ;;  %v392_v13 = vadd.f32 %v388_v7, %v382_v8 }
  0xce   :  { %v378_v15 = vrot.slane %v340_v12, 1  ;;  %v405_v25 = vmax.f32 %v401_v14, 0.0 }
  0xcf   :  { %v400_v17 = vadd.f32 %v1017_v3, %v392_v13 }
  0xd0   :  { %v380_v19 = vsel %vm379_vm2, %v377_v59, %v378_v15  ;;  %v383_v20 = vsel %vm379_vm2, %v378_v15, %v375_v4 }
  0xd1   :  { %v387_v21 = vsel %vm81_vm1, 0.0, %v383_v20  ;;  %v394_v22 = vadd.f32 %v390_v16, %v380_v19  ;;  %v404_v23 = vmax.f32 %v400_v17, 0.0  ;;  %v357_v35 = vpop.f32.mrf.mxu3 }
  0xd2   :  { %v395_v26 = vadd.f32 %v391_v18, %v387_v21 }
  0xd3   :  { %v408_v27 = vpack.c.bf16 %v405_v25, %v404_v23  ;;  %v402_v28 = vadd.f32 %v1017_v3, %v394_v22  ;;  %v673_v25 = vadd.f32 %v1018_v56, %v357_v35 }
  0xd4   :  { %v403_v29 = vadd.f32 %v1017_v3, %v395_v26 }
  0xd5   :  { %578 = vmatmul.bf16.vlgmr.msrb.gmra.mxu0 %v408_v27  ;;  %597 = vmatmul.bf16.vlgmr.msrb.gmra.mxu1 %v408_v27  ;;  %v406_v30 = vmax.f32 %v402_v28, 0.0 }
  0xd6   :  { %616 = vmatmul.bf16.vlgmr.msrb.gmra.mxu2 %v408_v27  ;;  %v407_v31 = vmax.f32 %v403_v29, 0.0 }
  0xd8   :  { %v409_v32 = vpack.c.bf16 %v407_v31, %v406_v30 }
  0xd9   :  { %v359_v37 = vpop.f32.mrf.mxu3 }
  0xda   :  { %583 = vmatmul.bf16.vlgmr.msrb.gmra.mxu3 %v409_v32  ;;  %v674_v27 = vadd.f32 %v1018_v56, %v359_v37 }
  0xe5   :  { %602 = vmatmul.bf16.gmra.mxu1 %v409_v32 }
  0xe6   :  { %621 = vmatmul.bf16.gmra.mxu2 %v409_v32 }
 0x152   :  { %v598_v36 = vpop.f32.mrf.mxu1  ;;  %v579_v24 = vpop.f32.mrf.mxu0 }
 0x153   :  { %v627_v45 = vrot.slane %v579_v24, 7 }
 0x159   :  { %v617_v38 = vpop.f32.mrf.mxu2 }
 0x15a   :  { %v600_v39 = vpop.f32.mrf.mxu1  ;;  %v581_v42 = vpop.f32.mrf.mxu0  ;;  %v639_v51 = vrot.slane %v617_v38, 1 }
 0x15b   :  { %v628_v43 = vrot.slane %v581_v42, 7 }
 0x15d   :  { %v584_v40 = vpop.f32.mrf.mxu3  ;;  %v633_v53 = vsel %vm366_vm0, %v627_v45, %v628_v43 }
 0x15e   :  { %v629_v60 = vrot.slane %v584_v40, 7  ;;  %v652_v62 = vadd.f32 %v633_v53, %v600_v39 }
 0x160   :  { %v632_v5 = vsel %vm366_vm0, %v628_v43, %v629_v60 }
 0x161   :  { %v619_v41 = vpop.f32.mrf.mxu2  ;;  %v637_v11 = vsel %vm78_vm3, 0.0, %v632_v5 }
 0x162   :  { %v640_v47 = vrot.slane %v619_v41, 1  ;;  %v603_v48 = vpop.f32.mrf.mxu1 }
 0x163   :  { %v653_v15 = vadd.f32 %v637_v11, %v603_v48 }
 0x164   :  { %v645_v61 = vsel %vm379_vm2, %v639_v51, %v640_v47 }
 0x165   :  { %v586_v44 = vpop.f32.mrf.mxu3 }
 0x166   :  { %v630_v46 = vrot.slane %v586_v44, 7 }
 0x168   :  { %v634_v50 = vsel %vm366_vm0, %v630_v46, %v627_v45  ;;  %v631_v16 = vsel %vm366_vm0, %v629_v60, %v630_v46 }
 0x169   :  { %v635_v54 = vsel %vm78_vm3, 0.0, %v634_v50  ;;  %v622_v55 = vpop.f32.mrf.mxu2 }
 0x16a   :  { %v651_v57 = vadd.f32 %v635_v54, %v598_v36  ;;  %v641_v59 = vrot.slane %v622_v55, 1  ;;  %v605_v9 = vpop.f32.mrf.mxu1 }
 0x16b   :  { %v654_v18 = vadd.f32 %v631_v16, %v605_v9 }
 0x16c   :  { %v655_v63 = vadd.f32 %v651_v57, %v645_v61  ;;  %v644_v0 = vsel %vm379_vm2, %v640_v47, %v641_v59 }
 0x16d   :  { %v648_v1 = vsel %vm81_vm1, 0.0, %v644_v0 }
 0x16e   :  { %v663_v3 = vadd.f32 %v1019_v58, %v655_v63  ;;  %v656_v4 = vadd.f32 %v652_v62, %v648_v1 }
 0x170   :  { %v675_v7 = vadd.f32 %v671_v2, %v663_v3  ;;  %v664_v8 = vadd.f32 %v1019_v58, %v656_v4 }
 0x171   :  { %v624_v10 = vpop.f32.mrf.mxu2 }
 0x172   :  { %v679_v12 = vmax.f32 %v675_v7, 0.0  ;;  %v676_v13 = vadd.f32 %v672_v6, %v664_v8  ;;  %v642_v14 = vrot.slane %v624_v10, 1 }
 0x174   :  { %683 = vst [vmem:[#allocation8] sm:$0xff] %v679_v12  ;;  %v680_v17 = vmax.f32 %v676_v13, 0.0  ;;  %v643_v19 = vsel %vm379_vm2, %v641_v59, %v642_v14  ;;  %v646_v20 = vsel %vm379_vm2, %v642_v14, %v639_v51 }
 0x175   :  { %v650_v21 = vsel %vm81_vm1, 0.0, %v646_v20  ;;  %v657_v22 = vadd.f32 %v653_v15, %v643_v19 }
 0x176   :  { %684 = vst [vmem:[#allocation8 + $0x8] sm:$0xff] %v680_v17  ;;  %v658_v23 = vadd.f32 %v654_v18, %v650_v21 }
 0x177   :  { %v665_v26 = vadd.f32 %v1019_v58, %v657_v22 }
 0x178   :  { %v666_v28 = vadd.f32 %v1019_v58, %v658_v23 }
 0x179   :  { %v677_v29 = vadd.f32 %v673_v25, %v665_v26 }
 0x17a   :  { %v678_v30 = vadd.f32 %v674_v27, %v666_v28 }
 0x17b   :  { %v681_v49 = vmax.f32 %v677_v29, 0.0 }
 0x17c   :  { %v682_v52 = vmax.f32 %v678_v30, 0.0 }
 0x17d   :  { %685 = vst [vmem:[#allocation8 + $0x10] sm:$0xff] %v681_v49 }
 0x17e   :  { %686 = vst [vmem:[#allocation8 + $0x18] sm:$0xff] %v682_v52 }
 0x17f   :  { %699 = dma.vmem_to_hbm [thread:$0]  %s692_s5, 512, %s694_s22, [#allocation4], %s1132_s23, %s1132_s23, %s1133_s24  }
 0x180   :  { %1120 = dma.done.wait [#allocation4], 512  }
 0x181   :  { %1121 = vsyncadd [#allocation4], 4294966784 }
 0x182   :  { %704 = vsyncpa [#allocation3], 1 }
 0x183   :  { %705 = vsyncpa [#allocation6], 1 }
 0x184   :  { %706 = vsyncpa [#allocation4], 1 }

</bundles_post_ra>
